<compile_context>
chip_gen: v5e
topology: v5e:2x2
jax: 0.10.0
libtpu: 0.0.40
codegen_flags: <defaults>
</compile_context>

<pallas_src>
import jax
import jax.numpy as jnp
from jax.experimental import pallas as pl
from jax.experimental.pallas import tpu as pltpu


LANE = 128                   # TPU lane quantum; last dims padded to this.
SUBLANE = 8                  # f32 sublane quantum; batch padded to this.
MXU_DTYPE = jnp.bfloat16     # MXU operand dtype (f32 accumulation kept).


def _round_up(n, m):
    return ((n + m - 1) // m) * m


def _pick_chunk(T, cap=8):
    """Largest divisor of T that is <= cap (bounds the unrolled inner loop)."""
    for c in range(min(T, cap), 0, -1):
        if T % c == 0:
            return c
    return 1


# ----------------------------------------------------------------------------
# Fused BiLSTM kernel.
#
#   x_ref   : (t_chunk*Bp, Vp)  time-major input rows; row = t_local*Bp + b
#   wif_ref : (Vp, 4*Hp)        forward dir W_ih^T (gate-major Hp-wide blocks)
#   whf_ref : (Hp, 4*Hp)        forward dir W_hh^T
#   bf_ref  : (1, 4*Hp)         forward dir b_ih + b_hh
#   wib_ref : (Vp, 4*Hp)        backward dir W_ih^T (hidden rows never needed)
#   bb_ref  : (1, 4*Hp)         backward dir b_ih + b_hh
#   wp_ref  : (2*Hp, Vp)        classifier W (rows: [fwd hidden ; bwd hidden])
#   bp_ref  : (1, Vp)           classifier b
#   out_ref : (Bp, Vp)          logits (lane-dense, padded)
#   h_scr, c_scr : (Bp, Hp) f32 forward-direction recurrent state (VMEM carry)
# ----------------------------------------------------------------------------
def bilstm_kernel(x_ref, wif_ref, whf_ref, bf_ref, wib_ref, bb_ref,
                  wp_ref, bp_ref, out_ref, h_scr, c_scr):
    chunk = pl.program_id(0)
    n_chunks = pl.num_programs(0)

    Bp, Hp = h_scr.shape
    rows, _ = x_ref.shape
    t_chunk = rows // Bp

    @pl.when(chunk == 0)
    def _():
        h_scr[...] = jnp.zeros_like(h_scr)
        c_scr[...] = jnp.zeros_like(c_scr)

    def cell(gates, c_prev):
        # gates: (Bp, 4*Hp) f32, PyTorch gate order i, f, g, o.
        # Hp is a multiple of 128, so every slice is a free tile-aligned view.
        i_g = jax.nn.sigmoid(gates[:, 0 * Hp:1 * Hp])
        f_g = jax.nn.sigmoid(gates[:, 1 * Hp:2 * Hp])
        g_g = jnp.tanh(gates[:, 2 * Hp:3 * Hp])
        o_g = jax.nn.sigmoid(gates[:, 3 * Hp:4 * Hp])
        c_new = f_g * c_prev + i_g * g_g
        h_new = o_g * jnp.tanh(c_new)
        return h_new, c_new

    # ---- input projection for the whole chunk: ONE MXU matmul, bias folded --
    gates_x = (jnp.dot(x_ref[...], wif_ref[...],
                       preferred_element_type=jnp.float32)
               + bf_ref[...])                           # (t_chunk*Bp, 4*Hp) f32

    w_hh = whf_ref[...]                                 # (Hp, 4*Hp) bf16

    # ---- forward direction: only the h-dot + nonlinearities are serial ------
    h = h_scr[...]
    c = c_scr[...]
    for t in range(t_chunk):        # bounded static unroll (t_chunk <= 8)
        gates = (gates_x[t * Bp:(t + 1) * Bp, :]
                 + jnp.dot(h.astype(w_hh.dtype), w_hh,
                           preferred_element_type=jnp.float32))
        h, c = cell(gates, c)
    h_scr[...] = h
    c_scr[...] = c

    # ---- last chunk: backward direction (single step) + fused projection ----
    @pl.when(chunk == n_chunks - 1)
    def _():
        # output[-1]'s backward half == backward cell applied to x[T-1] from a
        # zero state; the h0 @ W_hh_b term is exactly zero, so only W_ih_b is
        # needed (and only its input rows were packed / DMA'd).
        x_last = x_ref[(t_chunk - 1) * Bp:t_chunk * Bp, :]          # (Bp, Vp)
        gates_b = (jnp.dot(x_last, wib_ref[...],
                           preferred_element_type=jnp.float32) + bb_ref[...])
        h_b, _ = cell(gates_b, jnp.zeros((Bp, Hp), jnp.float32))

        # Classifier: two dots instead of concat + dot (no (Bp, 2Hp) copy).
        logits = (jnp.dot(h.astype(wp_ref.dtype), wp_ref[:Hp, :],
                          preferred_element_type=jnp.float32)
                  + jnp.dot(h_b.astype(wp_ref.dtype), wp_ref[Hp:, :],
                            preferred_element_type=jnp.float32)
                  + bp_ref[...])
        out_ref[...] = logits.astype(out_ref.dtype)


# ----------------------------------------------------------------------------
# Wrapper-side weight packing (pure XLA, runs once per call under jit).
# Gate (column-block) order i, f, g, o; each gate block padded H -> Hp, padded
# rows/cols are zero so padded hidden lanes stay exactly 0 in the recurrence.
# ----------------------------------------------------------------------------
def _pack_gate_cols(w_t, rows, rows_p, H, Hp):
    w4 = w_t.reshape(rows, 4, H)
    w4 = jnp.pad(w4, ((0, rows_p - rows), (0, 0), (0, Hp - H)))
    return w4.reshape(rows_p, 4 * Hp)


def _pack_lstm_input(w_ih, b_ih, b_hh, Vp, Hp):
    """w_ih: (4H, V) -> (Vp, 4*Hp) bf16; combined bias -> (1, 4*Hp) f32."""
    four_h, V = w_ih.shape
    H = four_h // 4
    w = _pack_gate_cols(w_ih.T, V, Vp, H, Hp).astype(MXU_DTYPE)
    b = jnp.pad((b_ih + b_hh).reshape(4, H),
                ((0, 0), (0, Hp - H))).reshape(1, 4 * Hp)
    return w, b.astype(jnp.float32)


def _pack_lstm_hidden(w_hh, Hp):
    """w_hh: (4H, H) -> (Hp, 4*Hp) bf16."""
    four_h, H = w_hh.shape
    return _pack_gate_cols(w_hh.T, H, Hp, H, Hp).astype(MXU_DTYPE)


def _pack_classifier(W, b, Hp, Vp):
    """(2H, V) classifier weight -> (2*Hp, Vp); rows laid out [fwd ; bwd]."""
    two_h, V = W.shape
    H = two_h // 2
    Wp = jnp.pad(W.reshape(2, H, V),
                 ((0, 0), (0, Hp - H), (0, Vp - V))).reshape(2 * Hp, Vp)
    bp = jnp.pad(b.reshape(1, V), ((0, 0), (0, Vp - V)))
    return Wp.astype(MXU_DTYPE), bp.astype(jnp.float32)


@jax.jit
def bilstm_forward(X, params):
    """X: (B, T, V) batch-first, exactly like the PyTorch module.  -> (B, V)."""
    B, T, V = X.shape
    H = params["w_hh_f"].shape[1]
    Vp = _round_up(V, LANE)
    Hp = _round_up(H, LANE)
    Bp = max(_round_up(B, SUBLANE), SUBLANE)

    t_chunk = _pick_chunk(T, cap=8)        # bounded in-kernel unroll
    n_chunks = T // t_chunk

    # Time-major, batch-padded, lane-padded 2-D input slab: row = t*Bp + b.
    # All per-step kernel reads become contiguous tile-aligned row slices.
    x_p = jnp.pad(X, ((0, Bp - B), (0, 0), (0, Vp - V)))
    x_p = jnp.transpose(x_p, (1, 0, 2)).reshape(T * Bp, Vp).astype(MXU_DTYPE)

    w_if, b_f = _pack_lstm_input(params["w_ih_f"], params["b_ih_f"],
                                 params["b_hh_f"], Vp, Hp)
    w_hf = _pack_lstm_hidden(params["w_hh_f"], Hp)
    # Backward direction: only the input rows are ever used (zero h0 for the
    # single step), so W_hh_b is never packed, DMA'd or held in VMEM.
    w_ib, b_b = _pack_lstm_input(params["w_ih_b"], params["b_ih_b"],
                                 params["b_hh_b"], Vp, Hp)
    w_p, b_p = _pack_classifier(params["W"], params["b"], Hp, Vp)

    # Constant-index weight/bias blocks: single-buffer them when the grid has
    # more than one step (default pipelining would double-buffer them for no
    # benefit -- matters most under v7x's 64 MiB VMEM at large H/V).
    const_mode = pl.Buffered(1) if n_chunks > 1 else None

    def const_spec(shape):
        if const_mode is None:
            return pl.BlockSpec(shape, lambda c: (0, 0))
        return pl.BlockSpec(shape, lambda c: (0, 0), pipeline_mode=const_mode)

    out_padded = pl.pallas_call(
        bilstm_kernel,
        out_shape=jax.ShapeDtypeStruct((Bp, Vp), jnp.float32),
        grid_spec=pltpu.PrefetchScalarGridSpec(
            num_scalar_prefetch=0,
            grid=(n_chunks,),
            in_specs=[
                pl.BlockSpec((t_chunk * Bp, Vp), lambda c: (c, 0)),  # x chunk
                const_spec((Vp, 4 * Hp)),        # fwd W_ih^T
                const_spec((Hp, 4 * Hp)),        # fwd W_hh^T
                const_spec((1, 4 * Hp)),         # fwd bias
                const_spec((Vp, 4 * Hp)),        # bwd W_ih^T (input rows only)
                const_spec((1, 4 * Hp)),         # bwd bias
                const_spec((2 * Hp, Vp)),        # classifier W
                const_spec((1, Vp)),             # classifier b
            ],
            out_specs=pl.BlockSpec((Bp, Vp), lambda c: (0, 0)),
            scratch_shapes=[
                pltpu.VMEM((Bp, Hp), jnp.float32),   # h carry (forward dir)
                pltpu.VMEM((Bp, Hp), jnp.float32),   # c carry (forward dir)
            ],
        ),
        compiler_params=pltpu.CompilerParams(
            dimension_semantics=("arbitrary",),      # sequential recurrence
            vmem_limit_bytes=32 * 1024 * 1024,       # explicit (v5e default=16M)
        ),
    )(x_p, w_if, w_hf, b_f, w_ib, b_b, w_p, b_p)

    return out_padded[:B, :V]


# ----------------------------------------------------------------------------
# Pure-JAX f32 reference of the PyTorch module's forward (full backward scan),
# used as an in-script correctness check.
# ----------------------------------------------------------------------------
def _reference_bilstm(X, params):
    B, T, V = X.shape
    H = params["w_hh_f"].shape[1]

    def run(x_seq, w_ih, w_hh, b_ih, b_hh):
        h = jnp.zeros((B, H), jnp.float32)
        c = jnp.zeros((B, H), jnp.float32)
        hs = []
        for t in range(x_seq.shape[0]):
            g = (jnp.dot(x_seq[t], w_ih.T, precision="highest")
                 + jnp.dot(h, w_hh.T, precision="highest") + b_ih + b_hh)
            i, f, gg, o = jnp.split(g, 4, axis=-1)
            c = jax.nn.sigmoid(f) * c + jax.nn.sigmoid(i) * jnp.tanh(gg)
            h = jax.nn.sigmoid(o) * jnp.tanh(c)
            hs.append(h)
        return jnp.stack(hs)                        # (T, B, H)

    x_tbf = jnp.transpose(X, (1, 0, 2))
    h_f = run(x_tbf, params["w_ih_f"], params["w_hh_f"],
              params["b_ih_f"], params["b_hh_f"])
    h_b = run(x_tbf[::-1], params["w_ih_b"], params["w_hh_b"],
              params["b_ih_b"], params["b_hh_b"])[::-1]
    out_last = jnp.concatenate([h_f[-1], h_b[-1]], axis=-1)    # (B, 2H)
    return jnp.dot(out_last, params["W"], precision="highest") + params["b"]


if __name__ == "__main__":
    # Small shapes consistent with the module: batch=2, seq=8, vocaSize=16, hidden=32
    B, T, V, H = 2, 8, 16, 32

    key = jax.random.PRNGKey(0)
    ks = jax.random.split(key, 11)

    X = jax.random.normal(ks[0], (B, T, V), jnp.float32)

    # nn.LSTM-style init: uniform(-1/sqrt(H), 1/sqrt(H)); classifier: torch.rand -> U[0, 1).
    s = 1.0 / jnp.sqrt(jnp.float32(H))

    def u(k, shape):
        return jax.random.uniform(k, shape, jnp.float32, -s, s)

    params = dict(
        # forward direction
        w_ih_f=u(ks[1], (4 * H, V)), w_hh_f=u(ks[2], (4 * H, H)),
        b_ih_f=u(ks[3], (4 * H,)),   b_hh_f=u(ks[4], (4 * H,)),
        # backward direction
        w_ih_b=u(ks[5], (4 * H, V)), w_hh_b=u(ks[6], (4 * H, H)),
        b_ih_b=u(ks[7], (4 * H,)),   b_hh_b=u(ks[8], (4 * H,)),
        # classifier
        W=jax.random.uniform(ks[9], (2 * H, V), jnp.float32),
        b=jax.random.uniform(ks[10], (V,), jnp.float32),
    )

    out = bilstm_forward(X, params)
    out = jax.block_until_ready(out)
    assert out.shape == (B, V), out.shape

    # Correctness vs the f32 reference; tolerance accounts for bf16 MXU
    # operands (f32 accumulation / f32 state) -- outputs here are O(1).
    ref = _reference_bilstm(X, params)
    err = float(jnp.max(jnp.abs(out - ref)))
    assert err < 5e-2, f"max abs error vs reference: {err}"

    print("KERNEL_OK")
</pallas_src>

<mosaic_0001>
module attributes {stable_mosaic.version = 11 : i64} {
  func.func @bilstm_kernel(%arg0: i32, %arg1: memref<64x128xbf16, #tpu.memory_space<vmem>>, %arg2: memref<128x512xbf16, #tpu.memory_space<vmem>>, %arg3: memref<128x512xbf16, #tpu.memory_space<vmem>>, %arg4: memref<1x512xf32, #tpu.memory_space<vmem>>, %arg5: memref<128x512xbf16, #tpu.memory_space<vmem>>, %arg6: memref<1x512xf32, #tpu.memory_space<vmem>>, %arg7: memref<256x128xbf16, #tpu.memory_space<vmem>>, %arg8: memref<1x128xf32, #tpu.memory_space<vmem>>, %arg9: memref<8x128xf32, #tpu.memory_space<vmem>>, %arg10: memref<8x128xf32, #tpu.memory_space<vmem>>, %arg11: memref<8x128xf32, #tpu.memory_space<vmem>>) attributes {dimension_semantics = [#tpu.dimension_semantics<arbitrary>], iteration_bounds = array<i64: 1>, scalar_prefetch = 0 : i64, scratch_operands = 2 : i64, tpu.core_type = #tpu.core_type<tc>, window_params = [{transform_indices = @transform_0, window_bounds = array<i64: 64, 128>}, {pipeline_mode = #tpu.pipeline_mode<synchronous>, transform_indices = @transform_1, window_bounds = array<i64: 128, 512>}, {pipeline_mode = #tpu.pipeline_mode<synchronous>, transform_indices = @transform_2, window_bounds = array<i64: 128, 512>}, {pipeline_mode = #tpu.pipeline_mode<synchronous>, transform_indices = @transform_3, window_bounds = array<i64: 1, 512>}, {pipeline_mode = #tpu.pipeline_mode<synchronous>, transform_indices = @transform_4, window_bounds = array<i64: 128, 512>}, {pipeline_mode = #tpu.pipeline_mode<synchronous>, transform_indices = @transform_5, window_bounds = array<i64: 1, 512>}, {pipeline_mode = #tpu.pipeline_mode<synchronous>, transform_indices = @transform_6, window_bounds = array<i64: 256, 128>}, {pipeline_mode = #tpu.pipeline_mode<synchronous>, transform_indices = @transform_7, window_bounds = array<i64: 1, 128>}, {pipeline_mode = #tpu.pipeline_mode<synchronous>, transform_indices = @transform_8, window_bounds = array<i64: 8, 128>}]} {
    %c0_i32 = arith.constant 0 : i32
    %0 = arith.cmpi eq, %arg0, %c0_i32 : i32
    %1 = arith.extui %0 : i1 to i32
    %c0_i32_0 = arith.constant 0 : i32
    %2 = arith.cmpi ne, %1, %c0_i32_0 : i32
    scf.if %2 {
      %cst_50 = arith.constant 0.000000e+00 : f32
      %249 = vector.broadcast %cst_50 : f32 to vector<8x128xf32>
      %c0_51 = arith.constant 0 : index
      %c0_52 = arith.constant 0 : index
      %250 = vector.load %arg10[%c0_51, %c0_52] : memref<8x128xf32, #tpu.memory_space<vmem>>, vector<8x128xf32>
      tpu.vector_store %arg10[%c0_51, %c0_52], %249 {strides = array<i32>} : memref<8x128xf32, #tpu.memory_space<vmem>>, vector<8x128xf32>,
      %cst_53 = arith.constant 0.000000e+00 : f32
      %251 = vector.broadcast %cst_53 : f32 to vector<8x128xf32>
      %c0_54 = arith.constant 0 : index
      %c0_55 = arith.constant 0 : index
      %252 = vector.load %arg11[%c0_54, %c0_55] : memref<8x128xf32, #tpu.memory_space<vmem>>, vector<8x128xf32>
      tpu.vector_store %arg11[%c0_54, %c0_55], %251 {strides = array<i32>} : memref<8x128xf32, #tpu.memory_space<vmem>>, vector<8x128xf32>,
    } else {
    }
    %c0 = arith.constant 0 : index
    %c0_1 = arith.constant 0 : index
    %3 = vector.load %arg1[%c0, %c0_1] : memref<64x128xbf16, #tpu.memory_space<vmem>>, vector<64x128xbf16>
    %c0_2 = arith.constant 0 : index
    %c0_3 = arith.constant 0 : index
    %4 = vector.load %arg2[%c0_2, %c0_3] : memref<128x512xbf16, #tpu.memory_space<vmem>>, vector<128x512xbf16>
    %cst = arith.constant dense<0.000000e+00> : vector<64x512xf32>
    %5 = tpu.matmul %3, %4, %cst {dimension_numbers = #tpu.dot_dimension_numbers<[1], [0], [0], [1], [0, 0, 1, 1], [], []>} : vector<64x128xbf16>, vector<128x512xbf16>, vector<64x512xf32> -> vector<64x512xf32>
    %c0_4 = arith.constant 0 : index
    %c0_5 = arith.constant 0 : index
    %6 = vector.load %arg4[%c0_4, %c0_5] : memref<1x512xf32, #tpu.memory_space<vmem>>, vector<1x512xf32>
    %7 = vector.broadcast %6 : vector<1x512xf32> to vector<64x512xf32>
    %8 = arith.addf %5, %7 : vector<64x512xf32>
    %c0_6 = arith.constant 0 : index
    %c0_7 = arith.constant 0 : index
    %9 = vector.load %arg3[%c0_6, %c0_7] : memref<128x512xbf16, #tpu.memory_space<vmem>>, vector<128x512xbf16>
    %c0_8 = arith.constant 0 : index
    %c0_9 = arith.constant 0 : index
    %10 = vector.load %arg10[%c0_8, %c0_9] : memref<8x128xf32, #tpu.memory_space<vmem>>, vector<8x128xf32>
    %c0_10 = arith.constant 0 : index
    %c0_11 = arith.constant 0 : index
    %11 = vector.load %arg11[%c0_10, %c0_11] : memref<8x128xf32, #tpu.memory_space<vmem>>, vector<8x128xf32>
    %12 = vector.extract_strided_slice %8 {offsets = [0, 0], sizes = [8, 512], strides = [1, 1]} : vector<64x512xf32> to vector<8x512xf32>
    %13 = arith.truncf %10 : vector<8x128xf32> to vector<8x128xbf16>
    %cst_12 = arith.constant dense<0.000000e+00> : vector<8x512xf32>
    %14 = tpu.matmul %13, %9, %cst_12 {dimension_numbers = #tpu.dot_dimension_numbers<[1], [0], [0], [1], [0, 0, 1, 1], [], []>} : vector<8x128xbf16>, vector<128x512xbf16>, vector<8x512xf32> -> vector<8x512xf32>
    %15 = arith.addf %12, %14 : vector<8x512xf32>
    %16 = vector.extract_strided_slice %15 {offsets = [0, 0], sizes = [8, 128], strides = [1, 1]} : vector<8x512xf32> to vector<8x128xf32>
    %17 = arith.negf %16 : vector<8x128xf32>
    %18 = math.exp %17 : vector<8x128xf32>
    %cst_13 = arith.constant 1.000000e+00 : f32
    %19 = vector.broadcast %cst_13 : f32 to vector<8x128xf32>
    %20 = arith.addf %19, %18 : vector<8x128xf32>
    %21 = arith.divf %19, %20 : vector<8x128xf32>
    %22 = vector.extract_strided_slice %15 {offsets = [0, 128], sizes = [8, 128], strides = [1, 1]} : vector<8x512xf32> to vector<8x128xf32>
    %23 = arith.negf %22 : vector<8x128xf32>
    %24 = math.exp %23 : vector<8x128xf32>
    %cst_14 = arith.constant 1.000000e+00 : f32
    %25 = vector.broadcast %cst_14 : f32 to vector<8x128xf32>
    %26 = arith.addf %25, %24 : vector<8x128xf32>
    %27 = arith.divf %25, %26 : vector<8x128xf32>
    %28 = vector.extract_strided_slice %15 {offsets = [0, 256], sizes = [8, 128], strides = [1, 1]} : vector<8x512xf32> to vector<8x128xf32>
    %29 = math.tanh %28 : vector<8x128xf32>
    %30 = vector.extract_strided_slice %15 {offsets = [0, 384], sizes = [8, 128], strides = [1, 1]} : vector<8x512xf32> to vector<8x128xf32>
    %31 = arith.negf %30 : vector<8x128xf32>
    %32 = math.exp %31 : vector<8x128xf32>
    %cst_15 = arith.constant 1.000000e+00 : f32
    %33 = vector.broadcast %cst_15 : f32 to vector<8x128xf32>
    %34 = arith.addf %33, %32 : vector<8x128xf32>
    %35 = arith.divf %33, %34 : vector<8x128xf32>
    %36 = arith.mulf %27, %11 : vector<8x128xf32>
    %37 = arith.mulf %21, %29 : vector<8x128xf32>
    %38 = arith.addf %36, %37 : vector<8x128xf32>
    %39 = math.tanh %38 : vector<8x128xf32>
    %40 = arith.mulf %35, %39 : vector<8x128xf32>
    %41 = vector.extract_strided_slice %8 {offsets = [8, 0], sizes = [8, 512], strides = [1, 1]} : vector<64x512xf32> to vector<8x512xf32>
    %42 = arith.truncf %40 : vector<8x128xf32> to vector<8x128xbf16>
    %cst_16 = arith.constant dense<0.000000e+00> : vector<8x512xf32>
    %43 = tpu.matmul %42, %9, %cst_16 {dimension_numbers = #tpu.dot_dimension_numbers<[1], [0], [0], [1], [0, 0, 1, 1], [], []>} : vector<8x128xbf16>, vector<128x512xbf16>, vector<8x512xf32> -> vector<8x512xf32>
    %44 = arith.addf %41, %43 : vector<8x512xf32>
    %45 = vector.extract_strided_slice %44 {offsets = [0, 0], sizes = [8, 128], strides = [1, 1]} : vector<8x512xf32> to vector<8x128xf32>
    %46 = arith.negf %45 : vector<8x128xf32>
    %47 = math.exp %46 : vector<8x128xf32>
    %cst_17 = arith.constant 1.000000e+00 : f32
    %48 = vector.broadcast %cst_17 : f32 to vector<8x128xf32>
    %49 = arith.addf %48, %47 : vector<8x128xf32>
    %50 = arith.divf %48, %49 : vector<8x128xf32>
    %51 = vector.extract_strided_slice %44 {offsets = [0, 128], sizes = [8, 128], strides = [1, 1]} : vector<8x512xf32> to vector<8x128xf32>
    %52 = arith.negf %51 : vector<8x128xf32>
    %53 = math.exp %52 : vector<8x128xf32>
    %cst_18 = arith.constant 1.000000e+00 : f32
    %54 = vector.broadcast %cst_18 : f32 to vector<8x128xf32>
    %55 = arith.addf %54, %53 : vector<8x128xf32>
    %56 = arith.divf %54, %55 : vector<8x128xf32>
    %57 = vector.extract_strided_slice %44 {offsets = [0, 256], sizes = [8, 128], strides = [1, 1]} : vector<8x512xf32> to vector<8x128xf32>
    %58 = math.tanh %57 : vector<8x128xf32>
    %59 = vector.extract_strided_slice %44 {offsets = [0, 384], sizes = [8, 128], strides = [1, 1]} : vector<8x512xf32> to vector<8x128xf32>
    %60 = arith.negf %59 : vector<8x128xf32>
    %61 = math.exp %60 : vector<8x128xf32>
    %cst_19 = arith.constant 1.000000e+00 : f32
    %62 = vector.broadcast %cst_19 : f32 to vector<8x128xf32>
    %63 = arith.addf %62, %61 : vector<8x128xf32>
    %64 = arith.divf %62, %63 : vector<8x128xf32>
    %65 = arith.mulf %56, %38 : vector<8x128xf32>
    %66 = arith.mulf %50, %58 : vector<8x128xf32>
    %67 = arith.addf %65, %66 : vector<8x128xf32>
    %68 = math.tanh %67 : vector<8x128xf32>
    %69 = arith.mulf %64, %68 : vector<8x128xf32>
    %70 = vector.extract_strided_slice %8 {offsets = [16, 0], sizes = [8, 512], strides = [1, 1]} : vector<64x512xf32> to vector<8x512xf32>
    %71 = arith.truncf %69 : vector<8x128xf32> to vector<8x128xbf16>
    %cst_20 = arith.constant dense<0.000000e+00> : vector<8x512xf32>
    %72 = tpu.matmul %71, %9, %cst_20 {dimension_numbers = #tpu.dot_dimension_numbers<[1], [0], [0], [1], [0, 0, 1, 1], [], []>} : vector<8x128xbf16>, vector<128x512xbf16>, vector<8x512xf32> -> vector<8x512xf32>
    %73 = arith.addf %70, %72 : vector<8x512xf32>
    %74 = vector.extract_strided_slice %73 {offsets = [0, 0], sizes = [8, 128], strides = [1, 1]} : vector<8x512xf32> to vector<8x128xf32>
    %75 = arith.negf %74 : vector<8x128xf32>
    %76 = math.exp %75 : vector<8x128xf32>
    %cst_21 = arith.constant 1.000000e+00 : f32
    %77 = vector.broadcast %cst_21 : f32 to vector<8x128xf32>
    %78 = arith.addf %77, %76 : vector<8x128xf32>
    %79 = arith.divf %77, %78 : vector<8x128xf32>
    %80 = vector.extract_strided_slice %73 {offsets = [0, 128], sizes = [8, 128], strides = [1, 1]} : vector<8x512xf32> to vector<8x128xf32>
    %81 = arith.negf %80 : vector<8x128xf32>
    %82 = math.exp %81 : vector<8x128xf32>
    %cst_22 = arith.constant 1.000000e+00 : f32
    %83 = vector.broadcast %cst_22 : f32 to vector<8x128xf32>
    %84 = arith.addf %83, %82 : vector<8x128xf32>
    %85 = arith.divf %83, %84 : vector<8x128xf32>
    %86 = vector.extract_strided_slice %73 {offsets = [0, 256], sizes = [8, 128], strides = [1, 1]} : vector<8x512xf32> to vector<8x128xf32>
    %87 = math.tanh %86 : vector<8x128xf32>
    %88 = vector.extract_strided_slice %73 {offsets = [0, 384], sizes = [8, 128], strides = [1, 1]} : vector<8x512xf32> to vector<8x128xf32>
    %89 = arith.negf %88 : vector<8x128xf32>
    %90 = math.exp %89 : vector<8x128xf32>
    %cst_23 = arith.constant 1.000000e+00 : f32
    %91 = vector.broadcast %cst_23 : f32 to vector<8x128xf32>
    %92 = arith.addf %91, %90 : vector<8x128xf32>
    %93 = arith.divf %91, %92 : vector<8x128xf32>
    %94 = arith.mulf %85, %67 : vector<8x128xf32>
    %95 = arith.mulf %79, %87 : vector<8x128xf32>
    %96 = arith.addf %94, %95 : vector<8x128xf32>
    %97 = math.tanh %96 : vector<8x128xf32>
    %98 = arith.mulf %93, %97 : vector<8x128xf32>
    %99 = vector.extract_strided_slice %8 {offsets = [24, 0], sizes = [8, 512], strides = [1, 1]} : vector<64x512xf32> to vector<8x512xf32>
    %100 = arith.truncf %98 : vector<8x128xf32> to vector<8x128xbf16>
    %cst_24 = arith.constant dense<0.000000e+00> : vector<8x512xf32>
    %101 = tpu.matmul %100, %9, %cst_24 {dimension_numbers = #tpu.dot_dimension_numbers<[1], [0], [0], [1], [0, 0, 1, 1], [], []>} : vector<8x128xbf16>, vector<128x512xbf16>, vector<8x512xf32> -> vector<8x512xf32>
    %102 = arith.addf %99, %101 : vector<8x512xf32>
    %103 = vector.extract_strided_slice %102 {offsets = [0, 0], sizes = [8, 128], strides = [1, 1]} : vector<8x512xf32> to vector<8x128xf32>
    %104 = arith.negf %103 : vector<8x128xf32>
    %105 = math.exp %104 : vector<8x128xf32>
    %cst_25 = arith.constant 1.000000e+00 : f32
    %106 = vector.broadcast %cst_25 : f32 to vector<8x128xf32>
    %107 = arith.addf %106, %105 : vector<8x128xf32>
    %108 = arith.divf %106, %107 : vector<8x128xf32>
    %109 = vector.extract_strided_slice %102 {offsets = [0, 128], sizes = [8, 128], strides = [1, 1]} : vector<8x512xf32> to vector<8x128xf32>
    %110 = arith.negf %109 : vector<8x128xf32>
    %111 = math.exp %110 : vector<8x128xf32>
    %cst_26 = arith.constant 1.000000e+00 : f32
    %112 = vector.broadcast %cst_26 : f32 to vector<8x128xf32>
    %113 = arith.addf %112, %111 : vector<8x128xf32>
    %114 = arith.divf %112, %113 : vector<8x128xf32>
    %115 = vector.extract_strided_slice %102 {offsets = [0, 256], sizes = [8, 128], strides = [1, 1]} : vector<8x512xf32> to vector<8x128xf32>
    %116 = math.tanh %115 : vector<8x128xf32>
    %117 = vector.extract_strided_slice %102 {offsets = [0, 384], sizes = [8, 128], strides = [1, 1]} : vector<8x512xf32> to vector<8x128xf32>
    %118 = arith.negf %117 : vector<8x128xf32>
    %119 = math.exp %118 : vector<8x128xf32>
    %cst_27 = arith.constant 1.000000e+00 : f32
    %120 = vector.broadcast %cst_27 : f32 to vector<8x128xf32>
    %121 = arith.addf %120, %119 : vector<8x128xf32>
    %122 = arith.divf %120, %121 : vector<8x128xf32>
    %123 = arith.mulf %114, %96 : vector<8x128xf32>
    %124 = arith.mulf %108, %116 : vector<8x128xf32>
    %125 = arith.addf %123, %124 : vector<8x128xf32>
    %126 = math.tanh %125 : vector<8x128xf32>
    %127 = arith.mulf %122, %126 : vector<8x128xf32>
    %128 = vector.extract_strided_slice %8 {offsets = [32, 0], sizes = [8, 512], strides = [1, 1]} : vector<64x512xf32> to vector<8x512xf32>
    %129 = arith.truncf %127 : vector<8x128xf32> to vector<8x128xbf16>
    %cst_28 = arith.constant dense<0.000000e+00> : vector<8x512xf32>
    %130 = tpu.matmul %129, %9, %cst_28 {dimension_numbers = #tpu.dot_dimension_numbers<[1], [0], [0], [1], [0, 0, 1, 1], [], []>} : vector<8x128xbf16>, vector<128x512xbf16>, vector<8x512xf32> -> vector<8x512xf32>
    %131 = arith.addf %128, %130 : vector<8x512xf32>
    %132 = vector.extract_strided_slice %131 {offsets = [0, 0], sizes = [8, 128], strides = [1, 1]} : vector<8x512xf32> to vector<8x128xf32>
    %133 = arith.negf %132 : vector<8x128xf32>
    %134 = math.exp %133 : vector<8x128xf32>
    %cst_29 = arith.constant 1.000000e+00 : f32
    %135 = vector.broadcast %cst_29 : f32 to vector<8x128xf32>
    %136 = arith.addf %135, %134 : vector<8x128xf32>
    %137 = arith.divf %135, %136 : vector<8x128xf32>
    %138 = vector.extract_strided_slice %131 {offsets = [0, 128], sizes = [8, 128], strides = [1, 1]} : vector<8x512xf32> to vector<8x128xf32>
    %139 = arith.negf %138 : vector<8x128xf32>
    %140 = math.exp %139 : vector<8x128xf32>
    %cst_30 = arith.constant 1.000000e+00 : f32
    %141 = vector.broadcast %cst_30 : f32 to vector<8x128xf32>
    %142 = arith.addf %141, %140 : vector<8x128xf32>
    %143 = arith.divf %141, %142 : vector<8x128xf32>
    %144 = vector.extract_strided_slice %131 {offsets = [0, 256], sizes = [8, 128], strides = [1, 1]} : vector<8x512xf32> to vector<8x128xf32>
    %145 = math.tanh %144 : vector<8x128xf32>
    %146 = vector.extract_strided_slice %131 {offsets = [0, 384], sizes = [8, 128], strides = [1, 1]} : vector<8x512xf32> to vector<8x128xf32>
    %147 = arith.negf %146 : vector<8x128xf32>
    %148 = math.exp %147 : vector<8x128xf32>
    %cst_31 = arith.constant 1.000000e+00 : f32
    %149 = vector.broadcast %cst_31 : f32 to vector<8x128xf32>
    %150 = arith.addf %149, %148 : vector<8x128xf32>
    %151 = arith.divf %149, %150 : vector<8x128xf32>
    %152 = arith.mulf %143, %125 : vector<8x128xf32>
    %153 = arith.mulf %137, %145 : vector<8x128xf32>
    %154 = arith.addf %152, %153 : vector<8x128xf32>
    %155 = math.tanh %154 : vector<8x128xf32>
    %156 = arith.mulf %151, %155 : vector<8x128xf32>
    %157 = vector.extract_strided_slice %8 {offsets = [40, 0], sizes = [8, 512], strides = [1, 1]} : vector<64x512xf32> to vector<8x512xf32>
    %158 = arith.truncf %156 : vector<8x128xf32> to vector<8x128xbf16>
    %cst_32 = arith.constant dense<0.000000e+00> : vector<8x512xf32>
    %159 = tpu.matmul %158, %9, %cst_32 {dimension_numbers = #tpu.dot_dimension_numbers<[1], [0], [0], [1], [0, 0, 1, 1], [], []>} : vector<8x128xbf16>, vector<128x512xbf16>, vector<8x512xf32> -> vector<8x512xf32>
    %160 = arith.addf %157, %159 : vector<8x512xf32>
    %161 = vector.extract_strided_slice %160 {offsets = [0, 0], sizes = [8, 128], strides = [1, 1]} : vector<8x512xf32> to vector<8x128xf32>
    %162 = arith.negf %161 : vector<8x128xf32>
    %163 = math.exp %162 : vector<8x128xf32>
    %cst_33 = arith.constant 1.000000e+00 : f32
    %164 = vector.broadcast %cst_33 : f32 to vector<8x128xf32>
    %165 = arith.addf %164, %163 : vector<8x128xf32>
    %166 = arith.divf %164, %165 : vector<8x128xf32>
    %167 = vector.extract_strided_slice %160 {offsets = [0, 128], sizes = [8, 128], strides = [1, 1]} : vector<8x512xf32> to vector<8x128xf32>
    %168 = arith.negf %167 : vector<8x128xf32>
    %169 = math.exp %168 : vector<8x128xf32>
    %cst_34 = arith.constant 1.000000e+00 : f32
    %170 = vector.broadcast %cst_34 : f32 to vector<8x128xf32>
    %171 = arith.addf %170, %169 : vector<8x128xf32>
    %172 = arith.divf %170, %171 : vector<8x128xf32>
    %173 = vector.extract_strided_slice %160 {offsets = [0, 256], sizes = [8, 128], strides = [1, 1]} : vector<8x512xf32> to vector<8x128xf32>
    %174 = math.tanh %173 : vector<8x128xf32>
    %175 = vector.extract_strided_slice %160 {offsets = [0, 384], sizes = [8, 128], strides = [1, 1]} : vector<8x512xf32> to vector<8x128xf32>
    %176 = arith.negf %175 : vector<8x128xf32>
    %177 = math.exp %176 : vector<8x128xf32>
    %cst_35 = arith.constant 1.000000e+00 : f32
    %178 = vector.broadcast %cst_35 : f32 to vector<8x128xf32>
    %179 = arith.addf %178, %177 : vector<8x128xf32>
    %180 = arith.divf %178, %179 : vector<8x128xf32>
    %181 = arith.mulf %172, %154 : vector<8x128xf32>
    %182 = arith.mulf %166, %174 : vector<8x128xf32>
    %183 = arith.addf %181, %182 : vector<8x128xf32>
    %184 = math.tanh %183 : vector<8x128xf32>
    %185 = arith.mulf %180, %184 : vector<8x128xf32>
    %186 = vector.extract_strided_slice %8 {offsets = [48, 0], sizes = [8, 512], strides = [1, 1]} : vector<64x512xf32> to vector<8x512xf32>
    %187 = arith.truncf %185 : vector<8x128xf32> to vector<8x128xbf16>
    %cst_36 = arith.constant dense<0.000000e+00> : vector<8x512xf32>
    %188 = tpu.matmul %187, %9, %cst_36 {dimension_numbers = #tpu.dot_dimension_numbers<[1], [0], [0], [1], [0, 0, 1, 1], [], []>} : vector<8x128xbf16>, vector<128x512xbf16>, vector<8x512xf32> -> vector<8x512xf32>
    %189 = arith.addf %186, %188 : vector<8x512xf32>
    %190 = vector.extract_strided_slice %189 {offsets = [0, 0], sizes = [8, 128], strides = [1, 1]} : vector<8x512xf32> to vector<8x128xf32>
    %191 = arith.negf %190 : vector<8x128xf32>
    %192 = math.exp %191 : vector<8x128xf32>
    %cst_37 = arith.constant 1.000000e+00 : f32
    %193 = vector.broadcast %cst_37 : f32 to vector<8x128xf32>
    %194 = arith.addf %193, %192 : vector<8x128xf32>
    %195 = arith.divf %193, %194 : vector<8x128xf32>
    %196 = vector.extract_strided_slice %189 {offsets = [0, 128], sizes = [8, 128], strides = [1, 1]} : vector<8x512xf32> to vector<8x128xf32>
    %197 = arith.negf %196 : vector<8x128xf32>
    %198 = math.exp %197 : vector<8x128xf32>
    %cst_38 = arith.constant 1.000000e+00 : f32
    %199 = vector.broadcast %cst_38 : f32 to vector<8x128xf32>
    %200 = arith.addf %199, %198 : vector<8x128xf32>
    %201 = arith.divf %199, %200 : vector<8x128xf32>
    %202 = vector.extract_strided_slice %189 {offsets = [0, 256], sizes = [8, 128], strides = [1, 1]} : vector<8x512xf32> to vector<8x128xf32>
    %203 = math.tanh %202 : vector<8x128xf32>
    %204 = vector.extract_strided_slice %189 {offsets = [0, 384], sizes = [8, 128], strides = [1, 1]} : vector<8x512xf32> to vector<8x128xf32>
    %205 = arith.negf %204 : vector<8x128xf32>
    %206 = math.exp %205 : vector<8x128xf32>
    %cst_39 = arith.constant 1.000000e+00 : f32
    %207 = vector.broadcast %cst_39 : f32 to vector<8x128xf32>
    %208 = arith.addf %207, %206 : vector<8x128xf32>
    %209 = arith.divf %207, %208 : vector<8x128xf32>
    %210 = arith.mulf %201, %183 : vector<8x128xf32>
    %211 = arith.mulf %195, %203 : vector<8x128xf32>
    %212 = arith.addf %210, %211 : vector<8x128xf32>
    %213 = math.tanh %212 : vector<8x128xf32>
    %214 = arith.mulf %209, %213 : vector<8x128xf32>
    %215 = vector.extract_strided_slice %8 {offsets = [56, 0], sizes = [8, 512], strides = [1, 1]} : vector<64x512xf32> to vector<8x512xf32>
    %216 = arith.truncf %214 : vector<8x128xf32> to vector<8x128xbf16>
    %cst_40 = arith.constant dense<0.000000e+00> : vector<8x512xf32>
    %217 = tpu.matmul %216, %9, %cst_40 {dimension_numbers = #tpu.dot_dimension_numbers<[1], [0], [0], [1], [0, 0, 1, 1], [], []>} : vector<8x128xbf16>, vector<128x512xbf16>, vector<8x512xf32> -> vector<8x512xf32>
    %218 = arith.addf %215, %217 : vector<8x512xf32>
    %219 = vector.extract_strided_slice %218 {offsets = [0, 0], sizes = [8, 128], strides = [1, 1]} : vector<8x512xf32> to vector<8x128xf32>
    %220 = arith.negf %219 : vector<8x128xf32>
    %221 = math.exp %220 : vector<8x128xf32>
    %cst_41 = arith.constant 1.000000e+00 : f32
    %222 = vector.broadcast %cst_41 : f32 to vector<8x128xf32>
    %223 = arith.addf %222, %221 : vector<8x128xf32>
    %224 = arith.divf %222, %223 : vector<8x128xf32>
    %225 = vector.extract_strided_slice %218 {offsets = [0, 128], sizes = [8, 128], strides = [1, 1]} : vector<8x512xf32> to vector<8x128xf32>
    %226 = arith.negf %225 : vector<8x128xf32>
    %227 = math.exp %226 : vector<8x128xf32>
    %cst_42 = arith.constant 1.000000e+00 : f32
    %228 = vector.broadcast %cst_42 : f32 to vector<8x128xf32>
    %229 = arith.addf %228, %227 : vector<8x128xf32>
    %230 = arith.divf %228, %229 : vector<8x128xf32>
    %231 = vector.extract_strided_slice %218 {offsets = [0, 256], sizes = [8, 128], strides = [1, 1]} : vector<8x512xf32> to vector<8x128xf32>
    %232 = math.tanh %231 : vector<8x128xf32>
    %233 = vector.extract_strided_slice %218 {offsets = [0, 384], sizes = [8, 128], strides = [1, 1]} : vector<8x512xf32> to vector<8x128xf32>
    %234 = arith.negf %233 : vector<8x128xf32>
    %235 = math.exp %234 : vector<8x128xf32>
    %cst_43 = arith.constant 1.000000e+00 : f32
    %236 = vector.broadcast %cst_43 : f32 to vector<8x128xf32>
    %237 = arith.addf %236, %235 : vector<8x128xf32>
    %238 = arith.divf %236, %237 : vector<8x128xf32>
    %239 = arith.mulf %230, %212 : vector<8x128xf32>
    %240 = arith.mulf %224, %232 : vector<8x128xf32>
    %241 = arith.addf %239, %240 : vector<8x128xf32>
    %242 = math.tanh %241 : vector<8x128xf32>
    %243 = arith.mulf %238, %242 : vector<8x128xf32>
    %c0_44 = arith.constant 0 : index
    %c0_45 = arith.constant 0 : index
    %244 = vector.load %arg10[%c0_44, %c0_45] : memref<8x128xf32, #tpu.memory_space<vmem>>, vector<8x128xf32>
    tpu.vector_store %arg10[%c0_44, %c0_45], %243 {strides = array<i32>} : memref<8x128xf32, #tpu.memory_space<vmem>>, vector<8x128xf32>,
    %c0_46 = arith.constant 0 : index
    %c0_47 = arith.constant 0 : index
    %245 = vector.load %arg11[%c0_46, %c0_47] : memref<8x128xf32, #tpu.memory_space<vmem>>, vector<8x128xf32>
    tpu.vector_store %arg11[%c0_46, %c0_47], %241 {strides = array<i32>} : memref<8x128xf32, #tpu.memory_space<vmem>>, vector<8x128xf32>,
    %c0_i32_48 = arith.constant 0 : i32
    %246 = arith.cmpi eq, %arg0, %c0_i32_48 : i32
    %247 = arith.extui %246 : i1 to i32
    %c0_i32_49 = arith.constant 0 : i32
    %248 = arith.cmpi ne, %247, %c0_i32_49 : i32
    scf.if %248 {
      %c56 = arith.constant 56 : index
      %c0_50 = arith.constant 0 : index
      %249 = vector.load %arg1[%c56, %c0_50] : memref<64x128xbf16, #tpu.memory_space<vmem>>, vector<8x128xbf16>
      %c0_51 = arith.constant 0 : index
      %c0_52 = arith.constant 0 : index
      %250 = vector.load %arg5[%c0_51, %c0_52] : memref<128x512xbf16, #tpu.memory_space<vmem>>, vector<128x512xbf16>
      %cst_53 = arith.constant dense<0.000000e+00> : vector<8x512xf32>
      %251 = tpu.matmul %249, %250, %cst_53 {dimension_numbers = #tpu.dot_dimension_numbers<[1], [0], [0], [1], [0, 0, 1, 1], [], []>} : vector<8x128xbf16>, vector<128x512xbf16>, vector<8x512xf32> -> vector<8x512xf32>
      %c0_54 = arith.constant 0 : index
      %c0_55 = arith.constant 0 : index
      %252 = vector.load %arg6[%c0_54, %c0_55] : memref<1x512xf32, #tpu.memory_space<vmem>>, vector<1x512xf32>
      %253 = vector.broadcast %252 : vector<1x512xf32> to vector<8x512xf32>
      %254 = arith.addf %251, %253 : vector<8x512xf32>
      %cst_56 = arith.constant 0.000000e+00 : f32
      %255 = vector.broadcast %cst_56 : f32 to vector<8x128xf32>
      %256 = vector.extract_strided_slice %254 {offsets = [0, 0], sizes = [8, 128], strides = [1, 1]} : vector<8x512xf32> to vector<8x128xf32>
      %257 = arith.negf %256 : vector<8x128xf32>
      %258 = math.exp %257 : vector<8x128xf32>
      %cst_57 = arith.constant 1.000000e+00 : f32
      %259 = vector.broadcast %cst_57 : f32 to vector<8x128xf32>
      %260 = arith.addf %259, %258 : vector<8x128xf32>
      %261 = arith.divf %259, %260 : vector<8x128xf32>
      %262 = vector.extract_strided_slice %254 {offsets = [0, 128], sizes = [8, 128], strides = [1, 1]} : vector<8x512xf32> to vector<8x128xf32>
      %263 = arith.negf %262 : vector<8x128xf32>
      %264 = math.exp %263 : vector<8x128xf32>
      %cst_58 = arith.constant 1.000000e+00 : f32
      %265 = vector.broadcast %cst_58 : f32 to vector<8x128xf32>
      %266 = arith.addf %265, %264 : vector<8x128xf32>
      %267 = arith.divf %265, %266 : vector<8x128xf32>
      %268 = vector.extract_strided_slice %254 {offsets = [0, 256], sizes = [8, 128], strides = [1, 1]} : vector<8x512xf32> to vector<8x128xf32>
      %269 = math.tanh %268 : vector<8x128xf32>
      %270 = vector.extract_strided_slice %254 {offsets = [0, 384], sizes = [8, 128], strides = [1, 1]} : vector<8x512xf32> to vector<8x128xf32>
      %271 = arith.negf %270 : vector<8x128xf32>
      %272 = math.exp %271 : vector<8x128xf32>
      %cst_59 = arith.constant 1.000000e+00 : f32
      %273 = vector.broadcast %cst_59 : f32 to vector<8x128xf32>
      %274 = arith.addf %273, %272 : vector<8x128xf32>
      %275 = arith.divf %273, %274 : vector<8x128xf32>
      %276 = arith.mulf %267, %255 : vector<8x128xf32>
      %277 = arith.mulf %261, %269 : vector<8x128xf32>
      %278 = arith.addf %276, %277 : vector<8x128xf32>
      %279 = math.tanh %278 : vector<8x128xf32>
      %280 = arith.mulf %275, %279 : vector<8x128xf32>
      %281 = arith.truncf %243 : vector<8x128xf32> to vector<8x128xbf16>
      %c0_60 = arith.constant 0 : index
      %c0_61 = arith.constant 0 : index
      %282 = vector.load %arg7[%c0_60, %c0_61] : memref<256x128xbf16, #tpu.memory_space<vmem>>, vector<128x128xbf16>
      %cst_62 = arith.constant dense<0.000000e+00> : vector<8x128xf32>
      %283 = tpu.matmul %281, %282, %cst_62 {dimension_numbers = #tpu.dot_dimension_numbers<[1], [0], [0], [1], [0, 0, 1, 1], [], []>} : vector<8x128xbf16>, vector<128x128xbf16>, vector<8x128xf32> -> vector<8x128xf32>
      %284 = arith.truncf %280 : vector<8x128xf32> to vector<8x128xbf16>
      %c128 = arith.constant 128 : index
      %c0_63 = arith.constant 0 : index
      %285 = vector.load %arg7[%c128, %c0_63] : memref<256x128xbf16, #tpu.memory_space<vmem>>, vector<128x128xbf16>
      %cst_64 = arith.constant dense<0.000000e+00> : vector<8x128xf32>
      %286 = tpu.matmul %284, %285, %cst_64 {dimension_numbers = #tpu.dot_dimension_numbers<[1], [0], [0], [1], [0, 0, 1, 1], [], []>} : vector<8x128xbf16>, vector<128x128xbf16>, vector<8x128xf32> -> vector<8x128xf32>
      %287 = arith.addf %283, %286 : vector<8x128xf32>
      %c0_65 = arith.constant 0 : index
      %c0_66 = arith.constant 0 : index
      %288 = vector.load %arg8[%c0_65, %c0_66] : memref<1x128xf32, #tpu.memory_space<vmem>>, vector<1x128xf32>
      %289 = vector.broadcast %288 : vector<1x128xf32> to vector<8x128xf32>
      %290 = arith.addf %287, %289 : vector<8x128xf32>
      %c0_67 = arith.constant 0 : index
      %c0_68 = arith.constant 0 : index
      %291 = vector.load %arg9[%c0_67, %c0_68] : memref<8x128xf32, #tpu.memory_space<vmem>>, vector<8x128xf32>
      tpu.vector_store %arg9[%c0_67, %c0_68], %290 {strides = array<i32>} : memref<8x128xf32, #tpu.memory_space<vmem>>, vector<8x128xf32>,
    } else {
    }
    return
  }
  func.func @transform_0(%arg0: i32) -> (i32, i32) {
    %c0_i32 = arith.constant 0 : i32
    %c0_i32_0 = arith.constant 0 : i32
    return %arg0, %c0_i32 : i32, i32
  }
  func.func @transform_1(%arg0: i32) -> (i32, i32) {
    %c0_i32 = arith.constant 0 : i32
    %c0_i32_0 = arith.constant 0 : i32
    %c0_i32_1 = arith.constant 0 : i32
    return %c0_i32, %c0_i32_0 : i32, i32
  }
  func.func @transform_2(%arg0: i32) -> (i32, i32) {
    %c0_i32 = arith.constant 0 : i32
    %c0_i32_0 = arith.constant 0 : i32
    %c0_i32_1 = arith.constant 0 : i32
    return %c0_i32, %c0_i32_0 : i32, i32
  }
  func.func @transform_3(%arg0: i32) -> (i32, i32) {
    %c0_i32 = arith.constant 0 : i32
    %c0_i32_0 = arith.constant 0 : i32
    %c0_i32_1 = arith.constant 0 : i32
    return %c0_i32, %c0_i32_0 : i32, i32
  }
  func.func @transform_4(%arg0: i32) -> (i32, i32) {
    %c0_i32 = arith.constant 0 : i32
    %c0_i32_0 = arith.constant 0 : i32
    %c0_i32_1 = arith.constant 0 : i32
    return %c0_i32, %c0_i32_0 : i32, i32
  }
  func.func @transform_5(%arg0: i32) -> (i32, i32) {
    %c0_i32 = arith.constant 0 : i32
    %c0_i32_0 = arith.constant 0 : i32
    %c0_i32_1 = arith.constant 0 : i32
    return %c0_i32, %c0_i32_0 : i32, i32
  }
  func.func @transform_6(%arg0: i32) -> (i32, i32) {
    %c0_i32 = arith.constant 0 : i32
    %c0_i32_0 = arith.constant 0 : i32
    %c0_i32_1 = arith.constant 0 : i32
    return %c0_i32, %c0_i32_0 : i32, i32
  }
  func.func @transform_7(%arg0: i32) -> (i32, i32) {
    %c0_i32 = arith.constant 0 : i32
    %c0_i32_0 = arith.constant 0 : i32
    %c0_i32_1 = arith.constant 0 : i32
    return %c0_i32, %c0_i32_0 : i32, i32
  }
  func.func @transform_8(%arg0: i32) -> (i32, i32) {
    %c0_i32 = arith.constant 0 : i32
    %c0_i32_0 = arith.constant 0 : i32
    %c0_i32_1 = arith.constant 0 : i32
    return %c0_i32, %c0_i32_0 : i32, i32
  }
}

</mosaic_0001>

<bundles_post_ra>
// kernel: bilstm_forward.1
= control target key start
LH: loop header
LB: loop body
LE: loop exit
PB: predicated region body
PF: predicated region fallthrough
CT: control target
= control target key end

     0   :  { %s4042_s1 = inlined_call_operand.vmem [shape: bf16[128,512], index: 1, kind: input, shape index: {}]   ;;  %s4043_s2 = inlined_call_operand.vmem [shape: bf16[128,512], index: 2, kind: input, shape index: {}]   ;;  %s4044_s0 = inlined_call_operand.vmem [shape: bf16[64,128], index: 0, kind: input, shape index: {}]   ;;  %s4045_s3 = inlined_call_operand.vmem [shape: f32[1,512], index: 3, kind: input, shape index: {}]   ;;  %s4046_s4 = inlined_call_operand.vmem [shape: bf16[128,512], index: 4, kind: input, shape index: {}]   ;;  %s4047_s6 = inlined_call_operand.vmem [shape: bf16[256,128], index: 6, kind: input, shape index: {}]   ;;  %s4048_s5 = inlined_call_operand.vmem [shape: f32[1,512], index: 5, kind: input, shape index: {}]   ;;  %s4049_s7 = inlined_call_operand.vmem [shape: f32[1,128], index: 7, kind: input, shape index: {}]   ;;  %s4050_s8 = inlined_call_operand.vmem [shape: f32[8,128], index: 8, kind: output, shape index: {}]  }
   0x1   :  { %v2158_v0 = vld [vmem:[%s4042_s1 + $0xe0] sm:$0xf]  ;;  %v2553_v1 = vld [vmem:[%s4042_s1 + $0xec] sm:$0xf0]  ;;  %v2551_v2 = vld [vmem:[%s4042_s1 + $0xe4] sm:$0xf] }
   0x2   :  { %v2159_v3 = vor.u32 %v2553_v1, %v2158_v0  ;;  %v2160_v4 = vld [vmem:[%s4042_s1 + $0xf0] sm:$0xf0]  ;;  %v2166_v5 = vld [vmem:[%s4042_s1 + $0xe8] sm:$0xf]  ;;  %v2554_v6 = vld [vmem:[%s4042_s1 + $0xf4] sm:$0xf0] }
   0x3   :  { %v2163_v7 = vor.u32 %v2551_v2, %v2160_v4  ;;  %v2167_v8 = vor.u32 %v2554_v6, %v2166_v5  ;;  %v2552_v9 = vld [vmem:[%s4042_s1 + $0xec] sm:$0xf]  ;;  %v2168_v10 = vld [vmem:[%s4042_s1 + $0xf8] sm:$0xf0]  ;;  %v2142_v11 = vld [vmem:[%s4042_s1 + $0xc0] sm:$0xf] }
   0x4   :  { %269 = vmatpush.bf16.msra.mxu0 %v2159_v3  ;;  %v2171_v12 = vor.u32 %v2552_v9, %v2168_v10  ;;  %v2549_v13 = vld [vmem:[%s4042_s1 + $0xcc] sm:$0xf0]  ;;  %v2547_v14 = vld [vmem:[%s4042_s1 + $0xc4] sm:$0xf]  ;;  %v2144_v15 = vld [vmem:[%s4042_s1 + $0xd0] sm:$0xf0] }
   0x5   :  { %298 = vmatpush.bf16.msra.mxu1 %v2163_v7  ;;  %327 = vmatpush.bf16.msra.mxu2 %v2167_v8  ;;  %v2143_v16 = vor.u32 %v2549_v13, %v2142_v11  ;;  %v2147_v17 = vor.u32 %v2547_v14, %v2144_v15  ;;  %v2150_v18 = vld [vmem:[%s4042_s1 + $0xc8] sm:$0xf]  ;;  %v2550_v19 = vld [vmem:[%s4042_s1 + $0xd4] sm:$0xf0]  ;;  %v2548_v20 = vld [vmem:[%s4042_s1 + $0xcc] sm:$0xf] }
   0x6   :  { %356 = vmatpush.bf16.msra.mxu3 %v2171_v12  ;;  %v2151_v21 = vor.u32 %v2550_v19, %v2150_v18  ;;  %v2152_v22 = vld [vmem:[%s4042_s1 + $0xd8] sm:$0xf0]  ;;  %v2126_v23 = vld [vmem:[%s4042_s1 + $0xa0] sm:$0xf]  ;;  %v2545_v24 = vld [vmem:[%s4042_s1 + $0xac] sm:$0xf0] }
   0x7   :  { %v2155_v25 = vor.u32 %v2548_v20, %v2152_v22  ;;  %v2543_v26 = vld [vmem:[%s4042_s1 + $0xa4] sm:$0xf]  ;;  %v2128_v27 = vld [vmem:[%s4042_s1 + $0xb0] sm:$0xf0]  ;;  %v2134_v28 = vld [vmem:[%s4042_s1 + $0xa8] sm:$0xf]  ;;  %v2127_v29 = vor.u32 %v2545_v24, %v2126_v23 }
   0x8   :  { %270 = vmatpush.bf16.msra.mxu0 %v2143_v16  ;;  %v2546_v30 = vld [vmem:[%s4042_s1 + $0xb4] sm:$0xf0]  ;;  %v2544_v31 = vld [vmem:[%s4042_s1 + $0xac] sm:$0xf]  ;;  %v2136_v32 = vld [vmem:[%s4042_s1 + $0xb8] sm:$0xf0]  ;;  %v2131_v33 = vor.u32 %v2543_v26, %v2128_v27 }
   0x9   :  { %299 = vmatpush.bf16.msra.mxu1 %v2147_v17  ;;  %328 = vmatpush.bf16.msra.mxu2 %v2151_v21  ;;  %v2135_v34 = vor.u32 %v2546_v30, %v2134_v28  ;;  %v2110_v35 = vld [vmem:[%s4042_s1 + $0x80] sm:$0xf]  ;;  %v2541_v36 = vld [vmem:[%s4042_s1 + $0x8c] sm:$0xf0]  ;;  %v2539_v37 = vld [vmem:[%s4042_s1 + $0x84] sm:$0xf]  ;;  %v2139_v38 = vor.u32 %v2544_v31, %v2136_v32 }
   0xa   :  { %357 = vmatpush.bf16.msra.mxu3 %v2155_v25  ;;  %v2112_v39 = vld [vmem:[%s4042_s1 + $0x90] sm:$0xf0]  ;;  %v2118_v40 = vld [vmem:[%s4042_s1 + $0x88] sm:$0xf]  ;;  %v2542_v41 = vld [vmem:[%s4042_s1 + $0x94] sm:$0xf0]  ;;  %v2111_v44 = vor.u32 %v2541_v36, %v2110_v35 }
   0xb   :  { %v2540_v42 = vld [vmem:[%s4042_s1 + $0x8c] sm:$0xf]  ;;  %v2120_v43 = vld [vmem:[%s4042_s1 + $0x98] sm:$0xf0]  ;;  %v2115_v45 = vor.u32 %v2539_v37, %v2112_v39  ;;  %v2119_v46 = vor.u32 %v2542_v41, %v2118_v40  ;;  %v2094_v47 = vld [vmem:[%s4042_s1 + $0x60] sm:$0xf] }
   0xc   :  { %271 = vmatpush.bf16.msra.mxu0 %v2127_v29  ;;  %v2537_v48 = vld [vmem:[%s4042_s1 + $0x6c] sm:$0xf0]  ;;  %v2535_v49 = vld [vmem:[%s4042_s1 + $0x64] sm:$0xf]  ;;  %v2123_v50 = vor.u32 %v2540_v42, %v2120_v43  ;;  %v2096_v51 = vld [vmem:[%s4042_s1 + $0x70] sm:$0xf0] }
   0xd   :  { %300 = vmatpush.bf16.msra.mxu1 %v2131_v33  ;;  %329 = vmatpush.bf16.msra.mxu2 %v2135_v34  ;;  %v2102_v52 = vld [vmem:[%s4042_s1 + $0x68] sm:$0xf]  ;;  %v2538_v53 = vld [vmem:[%s4042_s1 + $0x74] sm:$0xf0]  ;;  %v2536_v54 = vld [vmem:[%s4042_s1 + $0x6c] sm:$0xf]  ;;  %v2095_v56 = vor.u32 %v2537_v48, %v2094_v47  ;;  %v2099_v57 = vor.u32 %v2535_v49, %v2096_v51 }
   0xe   :  { %358 = vmatpush.bf16.msra.mxu3 %v2139_v38  ;;  %v2104_v55 = vld [vmem:[%s4042_s1 + $0x78] sm:$0xf0]  ;;  %v2103_v58 = vor.u32 %v2538_v53, %v2102_v52  ;;  %v2078_v59 = vld [vmem:[%s4042_s1 + $0x40] sm:$0xf]  ;;  %v2533_v60 = vld [vmem:[%s4042_s1 + $0x4c] sm:$0xf0] }
   0xf   :  { %v2531_v61 = vld [vmem:[%s4042_s1 + $0x44] sm:$0xf]  ;;  %v2107_v62 = vor.u32 %v2536_v54, %v2104_v55  ;;  %v2080_v63 = vld [vmem:[%s4042_s1 + $0x50] sm:$0xf0]  ;;  %v2086_v0 = vld [vmem:[%s4042_s1 + $0x48] sm:$0xf]  ;;  %v2079_v4 = vor.u32 %v2533_v60, %v2078_v59 }
  0x10   :  { %272 = vmatpush.bf16.msra.mxu0 %v2111_v44  ;;  %v2534_v1 = vld [vmem:[%s4042_s1 + $0x54] sm:$0xf0]  ;;  %v2532_v2 = vld [vmem:[%s4042_s1 + $0x4c] sm:$0xf]  ;;  %v2088_v3 = vld [vmem:[%s4042_s1 + $0x58] sm:$0xf0]  ;;  %v2083_v5 = vor.u32 %v2531_v61, %v2080_v63 }
  0x11   :  { %301 = vmatpush.bf16.msra.mxu1 %v2115_v45  ;;  %330 = vmatpush.bf16.msra.mxu2 %v2119_v46  ;;  %v2087_v6 = vor.u32 %v2534_v1, %v2086_v0  ;;  %v2062_v7 = vld [vmem:[%s4042_s1 + $0x20] sm:$0xf]  ;;  %v2529_v8 = vld [vmem:[%s4042_s1 + $0x2c] sm:$0xf0]  ;;  %v2527_v9 = vld [vmem:[%s4042_s1 + $0x24] sm:$0xf]  ;;  %v2091_v10 = vor.u32 %v2532_v2, %v2088_v3 }
  0x12   :  { %359 = vmatpush.bf16.msra.mxu3 %v2123_v50  ;;  %v2064_v11 = vld [vmem:[%s4042_s1 + $0x30] sm:$0xf0]  ;;  %v2070_v12 = vld [vmem:[%s4042_s1 + $0x28] sm:$0xf]  ;;  %v2530_v13 = vld [vmem:[%s4042_s1 + $0x34] sm:$0xf0]  ;;  %v2063_v16 = vor.u32 %v2529_v8, %v2062_v7 }
  0x13   :  { %v2528_v14 = vld [vmem:[%s4042_s1 + $0x2c] sm:$0xf]  ;;  %v2072_v15 = vld [vmem:[%s4042_s1 + $0x38] sm:$0xf0]  ;;  %v2046_v17 = vld [vmem:[%s4042_s1] sm:$0xf]  ;;  %v2067_v18 = vor.u32 %v2527_v9, %v2064_v11  ;;  %v2071_v19 = vor.u32 %v2530_v13, %v2070_v12 }
  0x14   :  { %273 = vmatpush.bf16.msra.mxu0 %v2095_v56  ;;  %v2525_v20 = vld [vmem:[%s4042_s1 + $0xc] sm:$0xf0]  ;;  %v2523_v21 = vld [vmem:[%s4042_s1 + $0x4] sm:$0xf]  ;;  %v2048_v22 = vld [vmem:[%s4042_s1 + $0x10] sm:$0xf0]  ;;  %v2075_v23 = vor.u32 %v2528_v14, %v2072_v15 }
  0x15   :  { %302 = vmatpush.bf16.msra.mxu1 %v2099_v57  ;;  %331 = vmatpush.bf16.msra.mxu2 %v2103_v58  ;;  %v2054_v24 = vld [vmem:[%s4042_s1 + $0x8] sm:$0xf]  ;;  %v2526_v25 = vld [vmem:[%s4042_s1 + $0x14] sm:$0xf0]  ;;  %v2524_v26 = vld [vmem:[%s4042_s1 + $0xc] sm:$0xf]  ;;  %v2047_v30 = vor.u32 %v2525_v20, %v2046_v17  ;;  %v2051_v33 = vor.u32 %v2523_v21, %v2048_v22 }
  0x16   :  { %360 = vmatpush.bf16.msra.mxu3 %v2107_v62  ;;  %v2056_v27 = vld [vmem:[%s4042_s1 + $0x18] sm:$0xf0]  ;;  %v2286_v28 = vld [vmem:[%s4043_s2 + $0xe0] sm:$0xf]  ;;  %v2585_v29 = vld [vmem:[%s4043_s2 + $0xec] sm:$0xf0]  ;;  %v2055_v34 = vor.u32 %v2526_v25, %v2054_v24 }
  0x17   :  { %v2583_v31 = vld [vmem:[%s4043_s2 + $0xe4] sm:$0xf]  ;;  %v2288_v32 = vld [vmem:[%s4043_s2 + $0xf0] sm:$0xf0]  ;;  %v2059_v36 = vor.u32 %v2524_v26, %v2056_v27  ;;  %v3034_v37 = vor.u32 %v2585_v29, %v2286_v28  ;;  %v2584_v38 = vld [vmem:[%s4043_s2 + $0xec] sm:$0xf] }
  0x18   :  { %274 = vmatpush.bf16.msra.mxu0 %v2079_v4  ;;  %v2519_v35 = vld [vmem:[%s4044_s0] sm:$0xff]  ;;  %v2294_v39 = vld [vmem:[%s4043_s2 + $0xe8] sm:$0xf]  ;;  %v2586_v40 = vld [vmem:[%s4043_s2 + $0xf4] sm:$0xf0]  ;;  %v3045_v41 = vor.u32 %v2583_v31, %v2288_v32 }
  0x19   :  { %303 = vmatpush.bf16.msra.mxu1 %v2083_v5  ;;  %332 = vmatpush.bf16.msra.mxu2 %v2087_v6  ;;  %v2296_v42 = vld [vmem:[%s4043_s2 + $0xf8] sm:$0xf0]  ;;  %v2270_v43 = vld [vmem:[%s4043_s2 + $0xc0] sm:$0xf]  ;;  %v2581_v44 = vld [vmem:[%s4043_s2 + $0xcc] sm:$0xf0]  ;;  %v3062_v47 = vor.u32 %v2586_v40, %v2294_v39 }
  0x1a   :  { %361 = vmatpush.bf16.msra.mxu3 %v2091_v10  ;;  %v2579_v45 = vld [vmem:[%s4043_s2 + $0xc4] sm:$0xf]  ;;  %v2272_v46 = vld [vmem:[%s4043_s2 + $0xd0] sm:$0xf0]  ;;  %v3065_v48 = vor.u32 %v2584_v38, %v2296_v42  ;;  %v3067_v49 = vor.u32 %v2581_v44, %v2270_v43  ;;  %v2580_v50 = vld [vmem:[%s4043_s2 + $0xcc] sm:$0xf] }
  0x1b   :  { %v2278_v51 = vld [vmem:[%s4043_s2 + $0xc8] sm:$0xf]  ;;  %v2582_v52 = vld [vmem:[%s4043_s2 + $0xd4] sm:$0xf0]  ;;  %v3079_v53 = vor.u32 %v2579_v45, %v2272_v46  ;;  %v2280_v54 = vld [vmem:[%s4043_s2 + $0xd8] sm:$0xf0] }
  0x1c   :  { %275 = vmatpush.bf16.msra.mxu0 %v2063_v16  ;;  %v2254_v55 = vld [vmem:[%s4043_s2 + $0xa0] sm:$0xf]  ;;  %v2577_v56 = vld [vmem:[%s4043_s2 + $0xac] sm:$0xf0]  ;;  %v2575_v57 = vld [vmem:[%s4043_s2 + $0xa4] sm:$0xf]  ;;  %v3097_v59 = vor.u32 %v2582_v52, %v2278_v51  ;;  %v3101_v60 = vor.u32 %v2580_v50, %v2280_v54 }
  0x1d   :  { %304 = vmatpush.bf16.msra.mxu1 %v2067_v18  ;;  %333 = vmatpush.bf16.msra.mxu2 %v2071_v19  ;;  %v2256_v58 = vld [vmem:[%s4043_s2 + $0xb0] sm:$0xf0]  ;;  %v3103_v61 = vor.u32 %v2577_v56, %v2254_v55  ;;  %v2576_v62 = vld [vmem:[%s4043_s2 + $0xac] sm:$0xf]  ;;  %v2262_v63 = vld [vmem:[%s4043_s2 + $0xa8] sm:$0xf] }
  0x1e   :  { %362 = vmatpush.bf16.msra.mxu3 %v2075_v23  ;;  %v2578_v0 = vld [vmem:[%s4043_s2 + $0xb4] sm:$0xf0]  ;;  %v3115_v1 = vor.u32 %v2575_v57, %v2256_v58  ;;  %v2264_v2 = vld [vmem:[%s4043_s2 + $0xb8] sm:$0xf0]  ;;  %v2238_v3 = vld [vmem:[%s4043_s2 + $0x80] sm:$0xf] }
  0x1f   :  { %v2573_v4 = vld [vmem:[%s4043_s2 + $0x8c] sm:$0xf0]  ;;  %v2571_v5 = vld [vmem:[%s4043_s2 + $0x84] sm:$0xf]  ;;  %v2240_v6 = vld [vmem:[%s4043_s2 + $0x90] sm:$0xf0]  ;;  %v3133_v7 = vor.u32 %v2578_v0, %v2262_v63  ;;  %v3137_v8 = vor.u32 %v2576_v62, %v2264_v2 }
  0x20   :  { %276 = vmatpush.bf16.msra.mxu0 %v2047_v30  ;;  %v3139_v9 = vor.u32 %v2573_v4, %v2238_v3  ;;  %v2572_v10 = vld [vmem:[%s4043_s2 + $0x8c] sm:$0xf]  ;;  %v2246_v11 = vld [vmem:[%s4043_s2 + $0x88] sm:$0xf]  ;;  %v2574_v12 = vld [vmem:[%s4043_s2 + $0x94] sm:$0xf0]  ;;  %v3151_v13 = vor.u32 %v2571_v5, %v2240_v6 }
  0x21   :  { %305 = vmatpush.bf16.msra.mxu1 %v2051_v33  ;;  %334 = vmatpush.bf16.msra.mxu2 %v2055_v34  ;;  %v2248_v14 = vld [vmem:[%s4043_s2 + $0x98] sm:$0xf0]  ;;  %v2222_v15 = vld [vmem:[%s4043_s2 + $0x60] sm:$0xf]  ;;  %v2569_v16 = vld [vmem:[%s4043_s2 + $0x6c] sm:$0xf0]  ;;  %v3172_v20 = vor.u32 %v2574_v12, %v2246_v11 }
  0x22   :  { %363 = vmatpush.bf16.msra.mxu3 %v2059_v36  ;;  %v2567_v17 = vld [vmem:[%s4043_s2 + $0x64] sm:$0xf]  ;;  %v2224_v18 = vld [vmem:[%s4043_s2 + $0x70] sm:$0xf0]  ;;  %v2520_v19 = vld [vmem:[%s4044_s0 + $0x8] sm:$0xff]  ;;  %v3176_v21 = vor.u32 %v2572_v10, %v2248_v14  ;;  %v3178_v22 = vor.u32 %v2569_v16, %v2222_v15 }
  0x23   :  { %277 = vmatmul.bf16.vlgmr.msra.gmra.mxu0 %v2519_v35  ;;  %v2568_v23 = vld [vmem:[%s4043_s2 + $0x6c] sm:$0xf]  ;;  %v2230_v24 = vld [vmem:[%s4043_s2 + $0x68] sm:$0xf]  ;;  %v2570_v25 = vld [vmem:[%s4043_s2 + $0x74] sm:$0xf0]  ;;  %v3190_v26 = vor.u32 %v2567_v17, %v2224_v18 }
  0x24   :  { %580 = vmatpush.bf16.msrb.mxu0 %v3034_v37  ;;  %306 = vmatmul.bf16.vlgmr.msra.gmra.mxu1 %v2519_v35  ;;  %v2232_v27 = vld [vmem:[%s4043_s2 + $0x78] sm:$0xf0]  ;;  %v2206_v28 = vld [vmem:[%s4043_s2 + $0x40] sm:$0xf]  ;;  %v2565_v29 = vld [vmem:[%s4043_s2 + $0x4c] sm:$0xf0]  ;;  %v3208_v32 = vor.u32 %v2570_v25, %v2230_v24 }
  0x25   :  { %593 = vmatpush.bf16.msrb.mxu1 %v3045_v41  ;;  %335 = vmatmul.bf16.vlgmr.msra.gmra.mxu2 %v2519_v35  ;;  %v2563_v30 = vld [vmem:[%s4043_s2 + $0x44] sm:$0xf]  ;;  %v2208_v31 = vld [vmem:[%s4043_s2 + $0x50] sm:$0xf0]  ;;  %v3212_v33 = vor.u32 %v2568_v23, %v2232_v27  ;;  %v3214_v34 = vor.u32 %v2565_v29, %v2206_v28  ;;  %v2564_v36 = vld [vmem:[%s4043_s2 + $0x4c] sm:$0xf] }
  0x26   :  { %364 = vmatmul.bf16.vlgmr.msra.gmra.mxu3 %v2519_v35  ;;  %606 = vmatpush.bf16.msrb.mxu2 %v3062_v47  ;;  %v3217_v35 = vor.u32 %v2563_v30, %v2208_v31  ;;  %v2216_v38 = vld [vmem:[%s4043_s2 + $0x58] sm:$0xf0]  ;;  %v2190_v39 = vld [vmem:[%s4043_s2 + $0x20] sm:$0xf]  ;;  %v2561_v40 = vld [vmem:[%s4043_s2 + $0x2c] sm:$0xf0] }
  0x27   :  { %619 = vmatpush.bf16.msrb.mxu3 %v3065_v48  ;;  %v2559_v42 = vld [vmem:[%s4043_s2 + $0x24] sm:$0xf]  ;;  %v3237_v43 = vor.u32 %v2564_v36, %v2216_v38  ;;  %v3239_v44 = vor.u32 %v2561_v40, %v2190_v39  ;;  %v2192_v45 = vld [vmem:[%s4043_s2 + $0x30] sm:$0xf0]  ;;  %v2214_v46 = vld [vmem:[%s4043_s2 + $0x48] sm:$0xf] }
  0x28   :  { %581 = vmatpush.bf16.msrb.mxu0 %v3067_v49  ;;  %v2566_v50 = vld [vmem:[%s4043_s2 + $0x54] sm:$0xf0]  ;;  %v3251_v51 = vor.u32 %v2559_v42, %v2192_v45  ;;  %v2560_v54 = vld [vmem:[%s4043_s2 + $0x2c] sm:$0xf]  ;;  %v2200_v55 = vld [vmem:[%s4043_s2 + $0x38] sm:$0xf0] }
  0x29   :  { %594 = vmatpush.bf16.msrb.mxu1 %v3079_v53  ;;  %v3253_v52 = vor.u32 %v2566_v50, %v2214_v46  ;;  %v2174_v56 = vld [vmem:[%s4043_s2] sm:$0xf]  ;;  %v2557_v57 = vld [vmem:[%s4043_s2 + $0xc] sm:$0xf0]  ;;  %v2555_v58 = vld [vmem:[%s4043_s2 + $0x4] sm:$0xf]  ;;  %v3282_v2 = vor.u32 %v2560_v54, %v2200_v55 }
  0x2a   :  { %607 = vmatpush.bf16.msrb.mxu2 %v3097_v59  ;;  %v2176_v62 = vld [vmem:[%s4043_s2 + $0x10] sm:$0xf0]  ;;  %v2198_v63 = vld [vmem:[%s4043_s2 + $0x28] sm:$0xf]  ;;  %v2562_v0 = vld [vmem:[%s4043_s2 + $0x34] sm:$0xf0]  ;;  %v3284_v3 = vor.u32 %v2557_v57, %v2174_v56 }
  0x2b   :  { %620 = vmatpush.bf16.msrb.mxu3 %v3101_v60  ;;  %v3286_v4 = vor.u32 %v2562_v0, %v2198_v63  ;;  %v2182_v5 = vld [vmem:[%s4043_s2 + $0x8] sm:$0xf]  ;;  %v2558_v6 = vld [vmem:[%s4043_s2 + $0x14] sm:$0xf0]  ;;  %v3295_v10 = vor.u32 %v2555_v58, %v2176_v62  ;;  %v2556_v11 = vld [vmem:[%s4043_s2 + $0xc] sm:$0xf] }
  0x2c   :  { %582 = vmatpush.bf16.msrb.mxu0 %v3103_v61  ;;  %v2184_v12 = vld [vmem:[%s4043_s2 + $0x18] sm:$0xf0]  ;;  %v3304_v14 = vor.u32 %v2558_v6, %v2182_v5  ;;  %v2521_v16 = vld [vmem:[%s4044_s0 + $0x10] sm:$0xff]  ;;  %v2781_v18 = vmov 0.0|0.0   ;;  %v75_v29 = vld [vmem:[%s4045_s3] sm:$0xf] }
  0x2d   :  { %595 = vmatpush.bf16.msrb.mxu1 %v3115_v1  ;;  %v3308_v15 = vor.u32 %v2556_v11, %v2184_v12  ;;  %v2522_v17 = vld [vmem:[%s4044_s0 + $0x18] sm:$0xff]  ;;  %v3394_v30 = vperm.slane %v75_v29, 0  ;;  %v3398_v36 = vperm.slane %v75_v29, 1  ;;  %v3408_v46 = vperm.slane %v75_v29, 2 }
  0x2e   :  { %608 = vmatpush.bf16.msrb.mxu2 %v3133_v7  ;;  %v3410_v50 = vperm.slane %v75_v29, 3 }
  0x2f   :  { %621 = vmatpush.bf16.msrb.mxu3 %v3137_v8 }
  0x30   :  { %583 = vmatpush.bf16.msrb.mxu0 %v3139_v9 }
  0x31   :  { %596 = vmatpush.bf16.msrb.mxu1 %v3151_v13 }
  0x32   :  { %609 = vmatpush.bf16.msrb.mxu2 %v3172_v20 }
  0x33   :  { %622 = vmatpush.bf16.msrb.mxu3 %v3176_v21  ;;  %282 = vmatmul.bf16.gmra.mxu0 %v2520_v19 }
  0x34   :  { %584 = vmatpush.bf16.msrb.mxu0 %v3178_v22  ;;  %311 = vmatmul.bf16.gmra.mxu1 %v2520_v19 }
  0x35   :  { %597 = vmatpush.bf16.msrb.mxu1 %v3190_v26  ;;  %340 = vmatmul.bf16.gmra.mxu2 %v2520_v19 }
  0x36   :  { %369 = vmatmul.bf16.gmra.mxu3 %v2520_v19  ;;  %610 = vmatpush.bf16.msrb.mxu2 %v3208_v32 }
  0x37   :  { %623 = vmatpush.bf16.msrb.mxu3 %v3212_v33 }
  0x38   :  { %585 = vmatpush.bf16.msrb.mxu0 %v3214_v34 }
  0x39   :  { %598 = vmatpush.bf16.msrb.mxu1 %v3217_v35 }
  0x3a   :  { %611 = vmatpush.bf16.msrb.mxu2 %v3253_v52 }
  0x3b   :  { %624 = vmatpush.bf16.msrb.mxu3 %v3237_v43 }
  0x3c   :  { %586 = vmatpush.bf16.msrb.mxu0 %v3239_v44 }
  0x3d   :  { %599 = vmatpush.bf16.msrb.mxu1 %v3251_v51 }
  0x3e   :  { %612 = vmatpush.bf16.msrb.mxu2 %v3286_v4 }
  0x3f   :  { %625 = vmatpush.bf16.msrb.mxu3 %v3282_v2 }
  0x40   :  { %587 = vmatpush.bf16.msrb.mxu0 %v3284_v3 }
  0x41   :  { %600 = vmatpush.bf16.msrb.mxu1 %v3295_v10 }
  0x42   :  { %613 = vmatpush.bf16.msrb.mxu2 %v3304_v14 }
  0x43   :  { %626 = vmatpush.bf16.msrb.mxu3 %v3308_v15  ;;  %287 = vmatmul.bf16.gmra.mxu0 %v2521_v16 }
  0x44   :  { %700 = vmatpush.bf16.msra.mxu0 %v3034_v37  ;;  %316 = vmatmul.bf16.gmra.mxu1 %v2521_v16 }
  0x45   :  { %713 = vmatpush.bf16.msra.mxu1 %v3045_v41  ;;  %345 = vmatmul.bf16.gmra.mxu2 %v2521_v16 }
  0x46   :  { %726 = vmatpush.bf16.msra.mxu2 %v3062_v47  ;;  %374 = vmatmul.bf16.gmra.mxu3 %v2521_v16 }
  0x47   :  { %739 = vmatpush.bf16.msra.mxu3 %v3065_v48 }
  0x48   :  { %701 = vmatpush.bf16.msra.mxu0 %v3067_v49 }
  0x49   :  { %714 = vmatpush.bf16.msra.mxu1 %v3079_v53 }
  0x4a   :  { %727 = vmatpush.bf16.msra.mxu2 %v3097_v59 }
  0x4b   :  { %740 = vmatpush.bf16.msra.mxu3 %v3101_v60 }
  0x4c   :  { %702 = vmatpush.bf16.msra.mxu0 %v3103_v61 }
  0x4d   :  { %715 = vmatpush.bf16.msra.mxu1 %v3115_v1 }
  0x4e   :  { %728 = vmatpush.bf16.msra.mxu2 %v3133_v7 }
  0x4f   :  { %741 = vmatpush.bf16.msra.mxu3 %v3137_v8 }
  0x50   :  { %703 = vmatpush.bf16.msra.mxu0 %v3139_v9 }
  0x51   :  { %716 = vmatpush.bf16.msra.mxu1 %v3151_v13 }
  0x52   :  { %729 = vmatpush.bf16.msra.mxu2 %v3172_v20 }
  0x53   :  { %742 = vmatpush.bf16.msra.mxu3 %v3176_v21  ;;  %292 = vmatmul.bf16.gmra.mxu0 %v2522_v17 }
  0x54   :  { %704 = vmatpush.bf16.msra.mxu0 %v3178_v22  ;;  %321 = vmatmul.bf16.gmra.mxu1 %v2522_v17 }
  0x55   :  { %717 = vmatpush.bf16.msra.mxu1 %v3190_v26  ;;  %350 = vmatmul.bf16.gmra.mxu2 %v2522_v17 }
  0x56   :  { %730 = vmatpush.bf16.msra.mxu2 %v3208_v32  ;;  %379 = vmatmul.bf16.gmra.mxu3 %v2522_v17 }
  0x57   :  { %743 = vmatpush.bf16.msra.mxu3 %v3212_v33 }
  0x58   :  { %705 = vmatpush.bf16.msra.mxu0 %v3214_v34 }
  0x59   :  { %718 = vmatpush.bf16.msra.mxu1 %v3217_v35 }
  0x5a   :  { %731 = vmatpush.bf16.msra.mxu2 %v3253_v52 }
  0x5b   :  { %744 = vmatpush.bf16.msra.mxu3 %v3237_v43 }
  0x5c   :  { %706 = vmatpush.bf16.msra.mxu0 %v3239_v44 }
  0x5d   :  { %719 = vmatpush.bf16.msra.mxu1 %v3251_v51 }
  0x5e   :  { %732 = vmatpush.bf16.msra.mxu2 %v3286_v4 }
  0x5f   :  { %745 = vmatpush.bf16.msra.mxu3 %v3282_v2 }
  0x60   :  { %707 = vmatpush.bf16.msra.mxu0 %v3284_v3 }
  0x61   :  { %720 = vmatpush.bf16.msra.mxu1 %v3295_v10 }
  0x62   :  { %733 = vmatpush.bf16.msra.mxu2 %v3304_v14 }
  0x63   :  { %746 = vmatpush.bf16.msra.mxu3 %v3308_v15  ;;  %588 = vmatmul.bf16.vlgmr.msrb.gmra.mxu0 %v2781_v18 }
  0x64   :  { %601 = vmatmul.bf16.vlgmr.msrb.gmra.mxu1 %v2781_v18  ;;  %820 = vmatpush.bf16.msrb.mxu0 %v3034_v37 }
  0x65   :  { %614 = vmatmul.bf16.vlgmr.msrb.gmra.mxu2 %v2781_v18  ;;  %833 = vmatpush.bf16.msrb.mxu1 %v3045_v41 }
  0x66   :  { %627 = vmatmul.bf16.vlgmr.msrb.gmra.mxu3 %v2781_v18  ;;  %846 = vmatpush.bf16.msrb.mxu2 %v3062_v47 }
  0x67   :  { %859 = vmatpush.bf16.msrb.mxu3 %v3065_v48 }
  0x68   :  { %821 = vmatpush.bf16.msrb.mxu0 %v3067_v49 }
  0x69   :  { %834 = vmatpush.bf16.msrb.mxu1 %v3079_v53 }
  0x6a   :  { %847 = vmatpush.bf16.msrb.mxu2 %v3097_v59 }
  0x6b   :  { %860 = vmatpush.bf16.msrb.mxu3 %v3101_v60 }
  0x6c   :  { %822 = vmatpush.bf16.msrb.mxu0 %v3103_v61 }
  0x6d   :  { %835 = vmatpush.bf16.msrb.mxu1 %v3115_v1 }
  0x6e   :  { %848 = vmatpush.bf16.msrb.mxu2 %v3133_v7 }
  0x6f   :  { %861 = vmatpush.bf16.msrb.mxu3 %v3137_v8 }
  0x70   :  { %823 = vmatpush.bf16.msrb.mxu0 %v3139_v9 }
  0x71   :  { %836 = vmatpush.bf16.msrb.mxu1 %v3151_v13 }
  0x72   :  { %849 = vmatpush.bf16.msrb.mxu2 %v3172_v20 }
  0x73   :  { %862 = vmatpush.bf16.msrb.mxu3 %v3176_v21 }
  0x74   :  { %824 = vmatpush.bf16.msrb.mxu0 %v3178_v22 }
  0x75   :  { %837 = vmatpush.bf16.msrb.mxu1 %v3190_v26 }
  0x76   :  { %850 = vmatpush.bf16.msrb.mxu2 %v3208_v32 }
  0x77   :  { %863 = vmatpush.bf16.msrb.mxu3 %v3212_v33 }
  0x78   :  { %825 = vmatpush.bf16.msrb.mxu0 %v3214_v34 }
  0x79   :  { %838 = vmatpush.bf16.msrb.mxu1 %v3217_v35 }
  0x7a   :  { %851 = vmatpush.bf16.msrb.mxu2 %v3253_v52 }
  0x7b   :  { %864 = vmatpush.bf16.msrb.mxu3 %v3237_v43 }
  0x7c   :  { %826 = vmatpush.bf16.msrb.mxu0 %v3239_v44 }
  0x7d   :  { %839 = vmatpush.bf16.msrb.mxu1 %v3251_v51 }
  0x7e   :  { %852 = vmatpush.bf16.msrb.mxu2 %v3286_v4 }
  0x7f   :  { %865 = vmatpush.bf16.msrb.mxu3 %v3282_v2 }
  0x80   :  { %827 = vmatpush.bf16.msrb.mxu0 %v3284_v3 }
  0x81   :  { %840 = vmatpush.bf16.msrb.mxu1 %v3295_v10 }
  0x82   :  { %853 = vmatpush.bf16.msrb.mxu2 %v3304_v14 }
  0x83   :  { %866 = vmatpush.bf16.msrb.mxu3 %v3308_v15 }
  0xa0   :  { %v278_v19 = vpop.f32.mrf.mxu0 }
  0xa1   :  { %v307_v23 = vpop.f32.mrf.mxu1 }
  0xa8   :  { %v3383_v24 = vpop.f32.mrf.mxu2  ;;  %v3387_v27 = vpop.f32.mrf.mxu0 }
  0xa9   :  { %v3385_v25 = vpop.f32.mrf.mxu3  ;;  %v3389_v28 = vpop.f32.mrf.mxu1 }
  0xb0   :  { %v3396_v31 = vpop.f32.mrf.mxu2  ;;  %v283_v39 = vpop.f32.mrf.mxu0 }
  0xb1   :  { %4051 = vst [vmem:[#allocation4_spill] sm:$0xff] %v3396_v31  ;;  %v3400_v38 = vpop.f32.mrf.mxu3  ;;  %v3403_v40 = vadd.f32 %v283_v39, %v3394_v30  ;;  %v312_v42 = vpop.f32.mrf.mxu1 }
  0xb2   :  { %v3406_v45 = vadd.f32 %v312_v42, %v3398_v36 }
  0xb3   :  { %4052 = vst [vmem:[#allocation5_spill] sm:$0xff] %v3403_v40 }
  0xb4   :  { %4053 = vst [vmem:[#allocation6_spill] sm:$0xff] %v3406_v45 }
  0xb8   :  { %v341_v54 = vpop.f32.mrf.mxu2  ;;  %v3415_v57 = vpop.f32.mrf.mxu0 }
  0xb9   :  { %v3413_v55 = vadd.f32 %v341_v54, %v3408_v46  ;;  %v370_v56 = vpop.f32.mrf.mxu3  ;;  %4055 = vst [vmem:[#allocation8_spill] sm:$0xff] %v3415_v57  ;;  %v3420_v62 = vpop.f32.mrf.mxu1 }
  0xba   :  { %v3418_v58 = vadd.f32 %v370_v56, %v3410_v50  ;;  %4057 = vst [vmem:[#allocation10_spill] sm:$0xff] %v3420_v62 }
  0xbb   :  { %4054 = vst [vmem:[#allocation7_spill] sm:$0xff] %v3413_v55 }
  0xbc   :  { %4056 = vst [vmem:[#allocation9_spill] sm:$0xff] %v3418_v58 }
  0xc0   :  { %v343_v63 = vpop.f32.mrf.mxu2  ;;  %v288_v6 = vpop.f32.mrf.mxu0 }
  0xc1   :  { %v3423_v0 = vadd.f32 %v343_v63, %v3408_v46  ;;  %v372_v5 = vpop.f32.mrf.mxu3  ;;  %v3429_v12 = vadd.f32 %v288_v6, %v3394_v30  ;;  %v317_v16 = vpop.f32.mrf.mxu1 }
  0xc2   :  { %v3426_v11 = vadd.f32 %v372_v5, %v3410_v50  ;;  %v3432_v17 = vadd.f32 %v317_v16, %v3398_v36 }
  0xc3   :  { %4058 = vst [vmem:[#allocation11_spill] sm:$0xff] %v3423_v0 }
  0xc4   :  { %4059 = vst [vmem:[#allocation12_spill] sm:$0xff] %v3426_v11 }
  0xc5   :  { %4060 = vst [vmem:[#allocation13_spill] sm:$0xff] %v3429_v12 }
  0xc6   :  { %4061 = vst [vmem:[#allocation14_spill] sm:$0xff] %v3432_v17 }
  0xc8   :  { %v346_v18 = vpop.f32.mrf.mxu2  ;;  %v290_v42 = vpop.f32.mrf.mxu0 }
  0xc9   :  { %v3435_v29 = vadd.f32 %v346_v18, %v3408_v46  ;;  %v375_v39 = vpop.f32.mrf.mxu3  ;;  %v3441_v56 = vadd.f32 %v290_v42, %v3394_v30  ;;  %v319_v63 = vpop.f32.mrf.mxu1 }
  0xca   :  { %v3438_v54 = vadd.f32 %v375_v39, %v3410_v50  ;;  %v3444_v5 = vadd.f32 %v319_v63, %v3398_v36 }
  0xcb   :  { %4062 = vst [vmem:[#allocation15_spill] sm:$0xff] %v3435_v29 }
  0xcc   :  { %4063 = vst [vmem:[#allocation16_spill] sm:$0xff] %v3438_v54 }
  0xcd   :  { %4064 = vst [vmem:[#allocation17_spill] sm:$0xff] %v3441_v56 }
  0xce   :  { %4065 = vst [vmem:[#allocation18_spill] sm:$0xff] %v3444_v5 }
  0xd0   :  { %v348_v6 = vpop.f32.mrf.mxu2  ;;  %v293_v12 = vpop.f32.mrf.mxu0 }
  0xd1   :  { %v3447_v16 = vadd.f32 %v348_v6, %v3408_v46  ;;  %v377_v17 = vpop.f32.mrf.mxu3  ;;  %v3453_v29 = vadd.f32 %v293_v12, %v3394_v30  ;;  %v322_v39 = vpop.f32.mrf.mxu1 }
  0xd2   :  { %v3450_v18 = vadd.f32 %v377_v17, %v3410_v50  ;;  %v3456_v42 = vadd.f32 %v322_v39, %v3398_v36 }
  0xd3   :  { %4066 = vst [vmem:[#allocation19_spill] sm:$0xff] %v3447_v16 }
  0xd4   :  { %4067 = vst [vmem:[#allocation20_spill] sm:$0xff] %v3450_v18 }
  0xd5   :  { %4068 = vst [vmem:[#allocation21_spill] sm:$0xff] %v3453_v29  ;;  %v279_v29 = vadd.f32 %v278_v19, %v3394_v30  ;;  %v366_v19 = vadd.f32 %v3385_v25, %v3410_v50 }
  0xd6   :  { %4069 = vst [vmem:[#allocation22_spill] sm:$0xff] %v3456_v42  ;;  %v308_v42 = vadd.f32 %v307_v23, %v3398_v36 }
  0xd8   :  { %v351_v56 = vpop.f32.mrf.mxu2  ;;  %v295_v54 = vpop.f32.mrf.mxu0 }
  0xd9   :  { %v3459_v63 = vadd.f32 %v351_v56, %v3408_v46  ;;  %v380_v5 = vpop.f32.mrf.mxu3  ;;  %v3465_v16 = vadd.f32 %v295_v54, %v3394_v30  ;;  %v324_v17 = vpop.f32.mrf.mxu1 }
  0xda   :  { %v3462_v6 = vadd.f32 %v380_v5, %v3410_v50  ;;  %v3468_v12 = vadd.f32 %v324_v17, %v3398_v36 }
  0xdb   :  { %4070 = vst [vmem:[#allocation23_spill] sm:$0xff] %v3459_v63 }
  0xdc   :  { %4071 = vst [vmem:[#allocation24_spill] sm:$0xff] %v3462_v6 }
  0xdd   :  { %4072 = vst [vmem:[#allocation25_spill] sm:$0xff] %v3465_v16 }
  0xde   :  { %4073 = vst [vmem:[#allocation26_spill] sm:$0xff] %v3468_v12 }
  0xe0   :  { %v353_v39 = vpop.f32.mrf.mxu2  ;;  %v589_v18 = vpop.f32.mrf.mxu0 }
  0xe1   :  { %v3473_v56 = vadd.f32 %v353_v39, %v3408_v46  ;;  %v382_v63 = vpop.f32.mrf.mxu3  ;;  %v632_v6 = vadd.f32 %v589_v18, %v279_v29  ;;  %v602_v54 = vpop.f32.mrf.mxu1 }
  0xe2   :  { %v3476_v5 = vadd.f32 %v382_v63, %v3410_v50  ;;  %v633_v16 = vadd.f32 %v602_v54, %v308_v42 }
  0xe3   :  { %4074 = vst [vmem:[#allocation27_spill] sm:$0xff] %v3473_v56  ;;  %v2300_v0 = vmul.f32 -1.442695, %v632_v6 }
  0xe4   :  { %4075 = vst [vmem:[#allocation28_spill] sm:$0xff] %v3476_v5  ;;  %v2301_v11 = vmul.f32 -1.442695, %v633_v16 }
  0xe5   :  { %2637 = vpow2.f32 %v2300_v0  ;;  %v337_v0 = vadd.f32 %v3383_v24, %v3408_v46 }
  0xe6   :  { %2639 = vpow2.f32 %v2301_v11 }
  0xe8   :  { %v615_v17 = vpop.f32.mrf.mxu2  ;;  %v591_v12 = vpop.f32.mrf.mxu0 }
  0xe9   :  { %v628_v23 = vpop.f32.mrf.mxu3  ;;  %v604_v56 = vpop.f32.mrf.mxu1  ;;  %v634_v18 = vadd.f32 %v615_v17, %v337_v0 }
  0xea   :  { %v635_v39 = vadd.f32 %v628_v23, %v366_v19 }
  0xeb   :  { %v2638_v62 = vpop.eup %2637 }
  0xec   :  { %v2302_v57 = vmul.f32 -1.442695, %v635_v39  ;;  %v2640_v55 = vpop.eup %2639  ;;  %v639_v63 = vadd.f32 1.0, %v2638_v62 }
  0xed   :  { %v658_v5 = vadd.f32 1.0, %v2640_v55 }
  0xee   :  { %2641 = vpow2.f32 %v2302_v57  ;;  %v651_v62 = vand.u32 2147483648, %v639_v63  ;;  %v649_v23 = vand.u32 2147483647, %v639_v63  ;;  %vm645_vm2 = vweird.f32 %v639_v63 }
  0xef   :  { %2643 = vrcp.f32 %v639_v63  ;;  %v670_v55 = vand.u32 2147483648, %v658_v5  ;;  %vm664_vm3 = vweird.f32 %v658_v5 }
  0xf0   :  { %2645 = vrcp.f32 %v658_v5  ;;  %v617_v29 = vpop.f32.mrf.mxu2  ;;  %v652_v17 = vor.u32 1.1754944e-38, %v651_v62  ;;  %vm650_vm5 = vcmp.eq.f32.partialorder %v649_v23, 8.507059e+37 }
  0xf1   :  { %v630_v16 = vpop.f32.mrf.mxu3  ;;  %v668_v29 = vand.u32 2147483647, %v658_v5 }
  0xf3   :  { %vm669_vm7 = vcmp.eq.f32.partialorder %v668_v29, 8.507059e+37 }
  0xf4   :  { %v2642_v11 = vpop.eup %2641 }
  0xf5   :  { %v2644_v25 = vpop.eup %2643  ;;  %v678_v42 = vadd.f32 1.0, %v2642_v11  ;;  %v671_v11 = vor.u32 1.1754944e-38, %v670_v55 }
  0xf6   :  { %v2646_v6 = vpop.eup %2645  ;;  %v641_v12 = vmul.f32 %v2644_v25, %v639_v63  ;;  %vm646_vm0 = vweird.f32 %v2644_v25 }
  0xf7   :  { %v660_v56 = vmul.f32 %v2646_v6, %v658_v5  ;;  %2647 = vrcp.f32 %v678_v42  ;;  %vm665_vm1 = vweird.f32 %v2646_v6  ;;  %vm647_vm4 = vmor %vm645_vm2, %vm646_vm0  ;;  %v690_v62 = vand.u32 2147483648, %v678_v42 }
  0xf8   :  { %v642_v54 = vsub.f32 1.0, %v641_v12  ;;  %2649 = vtanh.f32 %v634_v18  ;;  %vm666_vm6 = vmor %vm664_vm3, %vm665_vm1  ;;  %vm684_vm9 = vweird.f32 %v678_v42 }
  0xf9   :  { %v661_v19 = vsub.f32 1.0, %v660_v56  ;;  %v691_v23 = vor.u32 1.1754944e-38, %v690_v62 }
  0xfa   :  { %v643_v57 = vmul.f32 %v2644_v25, %v642_v54 }
  0xfb   :  { %v662_v39 = vmul.f32 %v2646_v6, %v661_v19 }
  0xfc   :  { %v644_v24 = vadd.f32 %v2644_v25, %v643_v57 }
  0xfd   :  { %v2648_v16 = vpop.eup %2647  ;;  %v663_v0 = vadd.f32 %v2646_v6, %v662_v39 }
  0xfe   :  { %v648_v58 = vsel %vm647_vm4, %v2644_v25, %v644_v24  ;;  %v680_v12 = vmul.f32 %v2648_v16, %v678_v42  ;;  %v2650_v18 = vpop.eup %2649  ;;  %vm685_vm8 = vweird.f32 %v2648_v16  ;;  %v688_v25 = vand.u32 2147483647, %v678_v42 }
  0xff   :  { %v653_v56 = vsel %vm650_vm5, %v652_v17, %v648_v58  ;;  %v667_v54 = vsel %vm666_vm6, %v2646_v6, %v663_v0  ;;  %vm686_vm10 = vmor %vm684_vm9, %vm685_vm8 }
 0x100   :  { %v672_v45 = vsel %vm669_vm7, %v671_v11, %v667_v54  ;;  %v695_v19 = vmul.f32 %v2650_v18, %v653_v56  ;;  %v681_v40 = vsub.f32 1.0, %v680_v12  ;;  %vm689_vm11 = vcmp.eq.f32.partialorder %v688_v25, 8.507059e+37 }
 0x101   :  { %v694_v31 = vmul.f32 0.0, %v672_v45  ;;  %v368_v11 = vadd.f32 %v3400_v38, %v3410_v50 }
 0x102   :  { %v682_v57 = vmul.f32 %v2648_v16, %v681_v40  ;;  %v310_v40 = vadd.f32 %v3389_v28, %v3398_v36 }
 0x103   :  { %v3482_v63 = vadd.f32 %v695_v19, %v694_v31  ;;  %v281_v31 = vadd.f32 %v3387_v27, %v3394_v30 }
 0x104   :  { %v683_v5 = vadd.f32 %v2648_v16, %v682_v57 }
 0x105   :  { %2651 = vtanh.f32 %v3482_v63 }
 0x106   :  { %v687_v55 = vsel %vm686_vm10, %v2648_v16, %v683_v5 }
 0x107   :  { %v692_v6 = vsel %vm689_vm11, %v691_v23, %v687_v55 }
 0x10b   :  { %v2652_v58 = vpop.eup %2651 }
 0x10c   :  { %v698_v39 = vmul.f32 %v2652_v58, %v692_v6  ;;  %v4076_v58 = vld [vmem:[#allocation4_spill] sm:$0xff] }
 0x10d   :  { %v339_v38 = vadd.f32 %v4076_v58, %v3408_v46 }
 0x10e   :  { %v699_v29 = vpack.c.bf16 %v698_v39, %v698_v39 }
 0x110   :  { %708 = vmatmul.bf16.vlgmr.msra.gmra.mxu0 %v699_v29  ;;  %721 = vmatmul.bf16.vlgmr.msra.gmra.mxu1 %v699_v29 }
 0x111   :  { %734 = vmatmul.bf16.vlgmr.msra.gmra.mxu2 %v699_v29  ;;  %747 = vmatmul.bf16.vlgmr.msra.gmra.mxu3 %v699_v29 }
 0x112   :  { %940 = vmatpush.bf16.msra.mxu0 %v3034_v37  ;;  %953 = vmatpush.bf16.msra.mxu1 %v3045_v41 }
 0x113   :  { %966 = vmatpush.bf16.msra.mxu2 %v3062_v47  ;;  %979 = vmatpush.bf16.msra.mxu3 %v3065_v48 }
 0x116   :  { %941 = vmatpush.bf16.msra.mxu0 %v3067_v49  ;;  %954 = vmatpush.bf16.msra.mxu1 %v3079_v53 }
 0x117   :  { %967 = vmatpush.bf16.msra.mxu2 %v3097_v59  ;;  %980 = vmatpush.bf16.msra.mxu3 %v3101_v60 }
 0x11a   :  { %942 = vmatpush.bf16.msra.mxu0 %v3103_v61  ;;  %955 = vmatpush.bf16.msra.mxu1 %v3115_v1 }
 0x11b   :  { %968 = vmatpush.bf16.msra.mxu2 %v3133_v7  ;;  %981 = vmatpush.bf16.msra.mxu3 %v3137_v8 }
 0x11e   :  { %943 = vmatpush.bf16.msra.mxu0 %v3139_v9  ;;  %956 = vmatpush.bf16.msra.mxu1 %v3151_v13 }
 0x11f   :  { %969 = vmatpush.bf16.msra.mxu2 %v3172_v20  ;;  %982 = vmatpush.bf16.msra.mxu3 %v3176_v21 }
 0x122   :  { %944 = vmatpush.bf16.msra.mxu0 %v3178_v22  ;;  %957 = vmatpush.bf16.msra.mxu1 %v3190_v26 }
 0x123   :  { %970 = vmatpush.bf16.msra.mxu2 %v3208_v32  ;;  %983 = vmatpush.bf16.msra.mxu3 %v3212_v33 }
 0x126   :  { %945 = vmatpush.bf16.msra.mxu0 %v3214_v34  ;;  %958 = vmatpush.bf16.msra.mxu1 %v3217_v35 }
 0x127   :  { %971 = vmatpush.bf16.msra.mxu2 %v3253_v52  ;;  %984 = vmatpush.bf16.msra.mxu3 %v3237_v43 }
 0x12a   :  { %946 = vmatpush.bf16.msra.mxu0 %v3239_v44  ;;  %959 = vmatpush.bf16.msra.mxu1 %v3251_v51 }
 0x12b   :  { %972 = vmatpush.bf16.msra.mxu2 %v3286_v4  ;;  %985 = vmatpush.bf16.msra.mxu3 %v3282_v2 }
 0x12e   :  { %947 = vmatpush.bf16.msra.mxu0 %v3284_v3  ;;  %960 = vmatpush.bf16.msra.mxu1 %v3295_v10 }
 0x12f   :  { %973 = vmatpush.bf16.msra.mxu2 %v3304_v14  ;;  %986 = vmatpush.bf16.msra.mxu3 %v3308_v15 }
 0x18d   :  { %v709_v45 = vpop.f32.mrf.mxu0  ;;  %v722_v42 = vpop.f32.mrf.mxu1 }
 0x18e   :  { %v752_v24 = vadd.f32 %v709_v45, %v281_v31  ;;  %v753_v16 = vadd.f32 %v722_v42, %v310_v40 }
 0x190   :  { %v2303_v17 = vmul.f32 -1.442695, %v752_v24  ;;  %v2304_v0 = vmul.f32 -1.442695, %v753_v16 }
 0x192   :  { %2653 = vpow2.f32 %v2303_v17 }
 0x193   :  { %2655 = vpow2.f32 %v2304_v0 }
 0x194   :  { %v735_v12 = vpop.f32.mrf.mxu2  ;;  %v748_v18 = vpop.f32.mrf.mxu3 }
 0x195   :  { %v755_v56 = vadd.f32 %v748_v18, %v368_v11  ;;  %v711_v54 = vpop.f32.mrf.mxu0  ;;  %v724_v19 = vpop.f32.mrf.mxu1  ;;  %v754_v39 = vadd.f32 %v735_v12, %v339_v38 }
 0x197   :  { %v2305_v27 = vmul.f32 -1.442695, %v755_v56 }
 0x198   :  { %v2654_v57 = vpop.eup %2653 }
 0x199   :  { %v2656_v5 = vpop.eup %2655  ;;  %v759_v28 = vadd.f32 1.0, %v2654_v57  ;;  %2657 = vpow2.f32 %v2305_v27 }
 0x19a   :  { %v778_v62 = vadd.f32 1.0, %v2656_v5 }
 0x19b   :  { %2659 = vrcp.f32 %v759_v28  ;;  %v771_v24 = vand.u32 2147483648, %v759_v28  ;;  %v769_v0 = vand.u32 2147483647, %v759_v28  ;;  %vm765_vm14 = vweird.f32 %v759_v28 }
 0x19c   :  { %2661 = vrcp.f32 %v778_v62  ;;  %v737_v25 = vpop.f32.mrf.mxu2  ;;  %v750_v55 = vpop.f32.mrf.mxu3  ;;  %v790_v16 = vand.u32 2147483648, %v778_v62  ;;  %v788_v18 = vand.u32 2147483647, %v778_v62  ;;  %vm784_vm15 = vweird.f32 %v778_v62 }
 0x19d   :  { %v772_v12 = vor.u32 1.1754944e-38, %v771_v24  ;;  %vm770_vm2 = vcmp.eq.f32.partialorder %v769_v0, 8.507059e+37  ;;  %v4077_v0 = vld [vmem:[#allocation5_spill] sm:$0xff] }
 0x19e   :  { %v791_v27 = vor.u32 1.1754944e-38, %v790_v16  ;;  %vm789_vm3 = vcmp.eq.f32.partialorder %v788_v18, 8.507059e+37  ;;  %v4078_v18 = vld [vmem:[#allocation6_spill] sm:$0xff] }
 0x19f   :  { %v2658_v23 = vpop.eup %2657 }
 0x1a0   :  { %v798_v50 = vadd.f32 1.0, %v2658_v23 }
 0x1a1   :  { %v2660_v6 = vpop.eup %2659 }
 0x1a2   :  { %v2662_v29 = vpop.eup %2661  ;;  %v761_v31 = vmul.f32 %v2660_v6, %v759_v28  ;;  %2663 = vrcp.f32 %v798_v50  ;;  %vm766_vm12 = vweird.f32 %v2660_v6  ;;  %vm804_vm5 = vweird.f32 %v798_v50 }
 0x1a3   :  { %v780_v40 = vmul.f32 %v2662_v29, %v778_v62  ;;  %2665 = vtanh.f32 %v754_v39  ;;  %vm785_vm13 = vweird.f32 %v2662_v29  ;;  %vm767_vm0 = vmor %vm765_vm14, %vm766_vm12 }
 0x1a4   :  { %v762_v45 = vsub.f32 1.0, %v761_v31  ;;  %vm786_vm1 = vmor %vm784_vm15, %vm785_vm13 }
 0x1a5   :  { %v781_v42 = vsub.f32 1.0, %v780_v40  ;;  %v810_v40 = vand.u32 2147483648, %v798_v50 }
 0x1a6   :  { %v763_v17 = vmul.f32 %v2660_v6, %v762_v45 }
 0x1a7   :  { %v782_v11 = vmul.f32 %v2662_v29, %v781_v42  ;;  %v811_v42 = vor.u32 1.1754944e-38, %v810_v40 }
 0x1a8   :  { %v2664_v56 = vpop.eup %2663  ;;  %v764_v46 = vadd.f32 %v2660_v6, %v763_v17 }
 0x1a9   :  { %v783_v54 = vadd.f32 %v2662_v29, %v782_v11  ;;  %v800_v19 = vmul.f32 %v2664_v56, %v798_v50  ;;  %v2666_v5 = vpop.eup %2665  ;;  %vm805_vm4 = vweird.f32 %v2664_v56 }
 0x1aa   :  { %v768_v57 = vsel %vm767_vm0, %v2660_v6, %v764_v46  ;;  %v808_v6 = vand.u32 2147483647, %v798_v50  ;;  %vm806_vm6 = vmor %vm804_vm5, %vm805_vm4 }
 0x1ab   :  { %v773_v25 = vsel %vm770_vm2, %v772_v12, %v768_v57  ;;  %v787_v55 = vsel %vm786_vm1, %v2662_v29, %v783_v54  ;;  %v801_v23 = vsub.f32 1.0, %v800_v19 }
 0x1ac   :  { %v792_v58 = vsel %vm789_vm3, %v791_v27, %v787_v55  ;;  %v815_v38 = vmul.f32 %v2666_v5, %v773_v25  ;;  %vm809_vm7 = vcmp.eq.f32.partialorder %v808_v6, 8.507059e+37  ;;  %v4079_v27 = vld [vmem:[#allocation9_spill] sm:$0xff] }
 0x1ad   :  { %v814_v39 = vmul.f32 %v792_v58, %v3482_v63  ;;  %v802_v31 = vmul.f32 %v2664_v56, %v801_v23 }
 0x1af   :  { %v3526_v28 = vadd.f32 %v815_v38, %v814_v39  ;;  %v803_v62 = vadd.f32 %v2664_v56, %v802_v31 }
 0x1b1   :  { %2667 = vtanh.f32 %v3526_v28  ;;  %v807_v45 = vsel %vm806_vm6, %v2664_v56, %v803_v62 }
 0x1b2   :  { %v812_v24 = vsel %vm809_vm7, %v811_v42, %v807_v45  ;;  %v4080_v42 = vld [vmem:[#allocation7_spill] sm:$0xff] }
 0x1b7   :  { %v2668_v29 = vpop.eup %2667 }
 0x1b8   :  { %v818_v16 = vmul.f32 %v2668_v29, %v812_v24 }
 0x1ba   :  { %v819_v17 = vpack.c.bf16 %v818_v16, %v818_v16 }
 0x1bc   :  { %828 = vmatmul.bf16.vlgmr.msrb.gmra.mxu0 %v819_v17  ;;  %841 = vmatmul.bf16.vlgmr.msrb.gmra.mxu1 %v819_v17 }
 0x1bd   :  { %854 = vmatmul.bf16.vlgmr.msrb.gmra.mxu2 %v819_v17  ;;  %867 = vmatmul.bf16.vlgmr.msrb.gmra.mxu3 %v819_v17 }
 0x1be   :  { %1060 = vmatpush.bf16.msrb.mxu0 %v3034_v37  ;;  %1073 = vmatpush.bf16.msrb.mxu1 %v3045_v41 }
 0x1bf   :  { %1086 = vmatpush.bf16.msrb.mxu2 %v3062_v47  ;;  %1099 = vmatpush.bf16.msrb.mxu3 %v3065_v48 }
 0x1c2   :  { %1061 = vmatpush.bf16.msrb.mxu0 %v3067_v49  ;;  %1074 = vmatpush.bf16.msrb.mxu1 %v3079_v53 }
 0x1c3   :  { %1087 = vmatpush.bf16.msrb.mxu2 %v3097_v59  ;;  %1100 = vmatpush.bf16.msrb.mxu3 %v3101_v60 }
 0x1c6   :  { %1062 = vmatpush.bf16.msrb.mxu0 %v3103_v61  ;;  %1075 = vmatpush.bf16.msrb.mxu1 %v3115_v1 }
 0x1c7   :  { %1088 = vmatpush.bf16.msrb.mxu2 %v3133_v7  ;;  %1101 = vmatpush.bf16.msrb.mxu3 %v3137_v8 }
 0x1ca   :  { %1063 = vmatpush.bf16.msrb.mxu0 %v3139_v9  ;;  %1076 = vmatpush.bf16.msrb.mxu1 %v3151_v13 }
 0x1cb   :  { %1089 = vmatpush.bf16.msrb.mxu2 %v3172_v20  ;;  %1102 = vmatpush.bf16.msrb.mxu3 %v3176_v21 }
 0x1ce   :  { %1064 = vmatpush.bf16.msrb.mxu0 %v3178_v22  ;;  %1077 = vmatpush.bf16.msrb.mxu1 %v3190_v26 }
 0x1cf   :  { %1090 = vmatpush.bf16.msrb.mxu2 %v3208_v32  ;;  %1103 = vmatpush.bf16.msrb.mxu3 %v3212_v33 }
 0x1d2   :  { %1065 = vmatpush.bf16.msrb.mxu0 %v3214_v34  ;;  %1078 = vmatpush.bf16.msrb.mxu1 %v3217_v35 }
 0x1d3   :  { %1091 = vmatpush.bf16.msrb.mxu2 %v3253_v52  ;;  %1104 = vmatpush.bf16.msrb.mxu3 %v3237_v43 }
 0x1d6   :  { %1066 = vmatpush.bf16.msrb.mxu0 %v3239_v44  ;;  %1079 = vmatpush.bf16.msrb.mxu1 %v3251_v51 }
 0x1d7   :  { %1092 = vmatpush.bf16.msrb.mxu2 %v3286_v4  ;;  %1105 = vmatpush.bf16.msrb.mxu3 %v3282_v2 }
 0x1da   :  { %1067 = vmatpush.bf16.msrb.mxu0 %v3284_v3  ;;  %1080 = vmatpush.bf16.msrb.mxu1 %v3295_v10 }
 0x1db   :  { %1093 = vmatpush.bf16.msrb.mxu2 %v3304_v14  ;;  %1106 = vmatpush.bf16.msrb.mxu3 %v3308_v15 }
 0x239   :  { %v829_v63 = vpop.f32.mrf.mxu0  ;;  %v842_v50 = vpop.f32.mrf.mxu1 }
 0x23a   :  { %v872_v11 = vadd.f32 %v829_v63, %v4077_v0  ;;  %v873_v56 = vadd.f32 %v842_v50, %v4078_v18 }
 0x23c   :  { %v2306_v46 = vmul.f32 -1.442695, %v872_v11  ;;  %v2307_v12 = vmul.f32 -1.442695, %v873_v56 }
 0x23e   :  { %2669 = vpow2.f32 %v2306_v46 }
 0x23f   :  { %2671 = vpow2.f32 %v2307_v12 }
 0x240   :  { %v855_v54 = vpop.f32.mrf.mxu2  ;;  %v868_v19 = vpop.f32.mrf.mxu3 }
 0x241   :  { %v875_v57 = vadd.f32 %v868_v19, %v4079_v27  ;;  %v831_v5 = vpop.f32.mrf.mxu0  ;;  %v844_v25 = vpop.f32.mrf.mxu1  ;;  %v874_v29 = vadd.f32 %v855_v54, %v4080_v42 }
 0x243   :  { %v2308_v55 = vmul.f32 -1.442695, %v875_v57 }
 0x244   :  { %v2670_v23 = vpop.eup %2669 }
 0x245   :  { %v2672_v58 = vpop.eup %2671  ;;  %v879_v38 = vadd.f32 1.0, %v2670_v23  ;;  %2673 = vpow2.f32 %v2308_v55 }
 0x246   :  { %v898_v39 = vadd.f32 1.0, %v2672_v58 }
 0x247   :  { %2675 = vrcp.f32 %v879_v38  ;;  %v891_v0 = vand.u32 2147483648, %v879_v38  ;;  %v889_v56 = vand.u32 2147483647, %v879_v38  ;;  %vm885_vm10 = vweird.f32 %v879_v38 }
 0x248   :  { %2677 = vrcp.f32 %v898_v39  ;;  %v857_v31 = vpop.f32.mrf.mxu2  ;;  %v870_v62 = vpop.f32.mrf.mxu3  ;;  %v910_v11 = vand.u32 2147483648, %v898_v39  ;;  %v908_v12 = vand.u32 2147483647, %v898_v39  ;;  %vm904_vm11 = vweird.f32 %v898_v39 }
 0x249   :  { %v892_v54 = vor.u32 1.1754944e-38, %v891_v0  ;;  %vm890_vm14 = vcmp.eq.f32.partialorder %v889_v56, 8.507059e+37  ;;  %v4082_v56 = vld [vmem:[#allocation10_spill] sm:$0xff] }
 0x24a   :  { %v911_v25 = vor.u32 1.1754944e-38, %v910_v11  ;;  %vm909_vm15 = vcmp.eq.f32.partialorder %v908_v12, 8.507059e+37 }
 0x24b   :  { %v2674_v40 = vpop.eup %2673 }
 0x24c   :  { %v918_v6 = vadd.f32 1.0, %v2674_v40 }
 0x24d   :  { %v2676_v45 = vpop.eup %2675 }
 0x24e   :  { %v2678_v24 = vpop.eup %2677  ;;  %v881_v16 = vmul.f32 %v2676_v45, %v879_v38  ;;  %2679 = vrcp.f32 %v918_v6  ;;  %vm886_vm8 = vweird.f32 %v2676_v45  ;;  %vm924_vm1 = vweird.f32 %v918_v6 }
 0x24f   :  { %v900_v17 = vmul.f32 %v2678_v24, %v898_v39  ;;  %2681 = vtanh.f32 %v874_v29  ;;  %vm905_vm9 = vweird.f32 %v2678_v24  ;;  %vm887_vm12 = vmor %vm885_vm10, %vm886_vm8 }
 0x250   :  { %v882_v63 = vsub.f32 1.0, %v881_v16  ;;  %vm906_vm13 = vmor %vm904_vm11, %vm905_vm9 }
 0x251   :  { %v901_v50 = vsub.f32 1.0, %v900_v17  ;;  %v930_v17 = vand.u32 2147483648, %v918_v6 }
 0x252   :  { %v883_v18 = vmul.f32 %v2676_v45, %v882_v63 }
 0x253   :  { %v902_v46 = vmul.f32 %v2678_v24, %v901_v50  ;;  %v931_v50 = vor.u32 1.1754944e-38, %v930_v17 }
 0x254   :  { %v2680_v19 = vpop.eup %2679  ;;  %v884_v27 = vadd.f32 %v2676_v45, %v883_v18 }
 0x255   :  { %v903_v57 = vadd.f32 %v2678_v24, %v902_v46  ;;  %v920_v5 = vmul.f32 %v2680_v19, %v918_v6  ;;  %v2682_v23 = vpop.eup %2681  ;;  %vm925_vm0 = vweird.f32 %v2680_v19  ;;  %v315_v46 = vadd.f32 %v4082_v56, %v3398_v36 }
 0x256   :  { %v888_v55 = vsel %vm887_vm12, %v2676_v45, %v884_v27  ;;  %v928_v45 = vand.u32 2147483647, %v918_v6  ;;  %vm926_vm2 = vmor %vm924_vm1, %vm925_vm0 }
 0x257   :  { %v893_v58 = vsel %vm890_vm14, %v892_v54, %v888_v55  ;;  %v907_v31 = vsel %vm906_vm13, %v2678_v24, %v903_v57  ;;  %v921_v62 = vsub.f32 1.0, %v920_v5 }
 0x258   :  { %v912_v40 = vsel %vm909_vm15, %v911_v25, %v907_v31  ;;  %v935_v42 = vmul.f32 %v2682_v23, %v893_v58  ;;  %vm929_vm3 = vcmp.eq.f32.partialorder %v928_v45, 8.507059e+37  ;;  %v4083_v23 = vld [vmem:[#allocation12_spill] sm:$0xff] }
 0x259   :  { %v934_v29 = vmul.f32 %v912_v40, %v3526_v28  ;;  %v922_v16 = vmul.f32 %v2680_v19, %v921_v62  ;;  %v4081_v28 = vld [vmem:[#allocation8_spill] sm:$0xff] }
 0x25a   :  { %v286_v6 = vadd.f32 %v4081_v28, %v3394_v30 }
 0x25b   :  { %v3566_v38 = vadd.f32 %v935_v42, %v934_v29  ;;  %v923_v39 = vadd.f32 %v2680_v19, %v922_v16 }
 0x25d   :  { %2683 = vtanh.f32 %v3566_v38  ;;  %v927_v63 = vsel %vm926_vm2, %v2680_v19, %v923_v39 }
 0x25e   :  { %v932_v0 = vsel %vm929_vm3, %v931_v50, %v927_v63  ;;  %v4084_v50 = vld [vmem:[#allocation11_spill] sm:$0xff] }
 0x263   :  { %v2684_v24 = vpop.eup %2683 }
 0x264   :  { %v938_v11 = vmul.f32 %v2684_v24, %v932_v0 }
 0x266   :  { %v939_v18 = vpack.c.bf16 %v938_v11, %v938_v11 }
 0x268   :  { %948 = vmatmul.bf16.vlgmr.msra.gmra.mxu0 %v939_v18  ;;  %961 = vmatmul.bf16.vlgmr.msra.gmra.mxu1 %v939_v18 }
 0x269   :  { %974 = vmatmul.bf16.vlgmr.msra.gmra.mxu2 %v939_v18  ;;  %987 = vmatmul.bf16.vlgmr.msra.gmra.mxu3 %v939_v18 }
 0x26a   :  { %1180 = vmatpush.bf16.msra.mxu0 %v3034_v37  ;;  %1193 = vmatpush.bf16.msra.mxu1 %v3045_v41 }
 0x26b   :  { %1206 = vmatpush.bf16.msra.mxu2 %v3062_v47  ;;  %1219 = vmatpush.bf16.msra.mxu3 %v3065_v48 }
 0x26e   :  { %1181 = vmatpush.bf16.msra.mxu0 %v3067_v49  ;;  %1194 = vmatpush.bf16.msra.mxu1 %v3079_v53 }
 0x26f   :  { %1207 = vmatpush.bf16.msra.mxu2 %v3097_v59  ;;  %1220 = vmatpush.bf16.msra.mxu3 %v3101_v60 }
 0x272   :  { %1182 = vmatpush.bf16.msra.mxu0 %v3103_v61  ;;  %1195 = vmatpush.bf16.msra.mxu1 %v3115_v1 }
 0x273   :  { %1208 = vmatpush.bf16.msra.mxu2 %v3133_v7  ;;  %1221 = vmatpush.bf16.msra.mxu3 %v3137_v8 }
 0x276   :  { %1183 = vmatpush.bf16.msra.mxu0 %v3139_v9  ;;  %1196 = vmatpush.bf16.msra.mxu1 %v3151_v13 }
 0x277   :  { %1209 = vmatpush.bf16.msra.mxu2 %v3172_v20  ;;  %1222 = vmatpush.bf16.msra.mxu3 %v3176_v21 }
 0x27a   :  { %1184 = vmatpush.bf16.msra.mxu0 %v3178_v22  ;;  %1197 = vmatpush.bf16.msra.mxu1 %v3190_v26 }
 0x27b   :  { %1210 = vmatpush.bf16.msra.mxu2 %v3208_v32  ;;  %1223 = vmatpush.bf16.msra.mxu3 %v3212_v33 }
 0x27e   :  { %1185 = vmatpush.bf16.msra.mxu0 %v3214_v34  ;;  %1198 = vmatpush.bf16.msra.mxu1 %v3217_v35 }
 0x27f   :  { %1211 = vmatpush.bf16.msra.mxu2 %v3253_v52  ;;  %1224 = vmatpush.bf16.msra.mxu3 %v3237_v43 }
 0x282   :  { %1186 = vmatpush.bf16.msra.mxu0 %v3239_v44  ;;  %1199 = vmatpush.bf16.msra.mxu1 %v3251_v51 }
 0x283   :  { %1212 = vmatpush.bf16.msra.mxu2 %v3286_v4  ;;  %1225 = vmatpush.bf16.msra.mxu3 %v3282_v2 }
 0x286   :  { %1187 = vmatpush.bf16.msra.mxu0 %v3284_v3  ;;  %1200 = vmatpush.bf16.msra.mxu1 %v3295_v10 }
 0x287   :  { %1213 = vmatpush.bf16.msra.mxu2 %v3304_v14  ;;  %1226 = vmatpush.bf16.msra.mxu3 %v3308_v15 }
 0x2e5   :  { %v949_v12 = vpop.f32.mrf.mxu0  ;;  %v962_v19 = vpop.f32.mrf.mxu1 }
 0x2e6   :  { %v992_v27 = vadd.f32 %v949_v12, %v286_v6  ;;  %v993_v54 = vadd.f32 %v962_v19, %v315_v46 }
 0x2e8   :  { %v2309_v57 = vmul.f32 -1.442695, %v992_v27  ;;  %v2310_v5 = vmul.f32 -1.442695, %v993_v54 }
 0x2ea   :  { %2685 = vpow2.f32 %v2309_v57 }
 0x2eb   :  { %2687 = vpow2.f32 %v2310_v5 }
 0x2ec   :  { %v975_v25 = vpop.f32.mrf.mxu2  ;;  %v988_v55 = vpop.f32.mrf.mxu3 }
 0x2ed   :  { %v995_v58 = vadd.f32 %v988_v55, %v4083_v23  ;;  %v951_v31 = vpop.f32.mrf.mxu0  ;;  %v964_v62 = vpop.f32.mrf.mxu1  ;;  %v994_v24 = vadd.f32 %v975_v25, %v4084_v50 }
 0x2ef   :  { %v2311_v40 = vmul.f32 -1.442695, %v995_v58 }
 0x2f0   :  { %v2686_v42 = vpop.eup %2685 }
 0x2f1   :  { %v2688_v30 = vpop.eup %2687  ;;  %v999_v29 = vadd.f32 1.0, %v2686_v42  ;;  %2689 = vpow2.f32 %v2311_v40 }
 0x2f2   :  { %v1018_v36 = vadd.f32 1.0, %v2688_v30 }
 0x2f3   :  { %2691 = vrcp.f32 %v999_v29  ;;  %v1011_v56 = vand.u32 2147483648, %v999_v29  ;;  %v1009_v19 = vand.u32 2147483647, %v999_v29  ;;  %vm1005_vm6 = vweird.f32 %v999_v29 }
 0x2f4   :  { %2693 = vrcp.f32 %v1018_v36  ;;  %v977_v16 = vpop.f32.mrf.mxu2  ;;  %v990_v39 = vpop.f32.mrf.mxu3  ;;  %v1030_v46 = vand.u32 2147483648, %v1018_v36  ;;  %v1028_v54 = vand.u32 2147483647, %v1018_v36  ;;  %vm1024_vm7 = vweird.f32 %v1018_v36 }
 0x2f5   :  { %v1012_v25 = vor.u32 1.1754944e-38, %v1011_v56  ;;  %vm1010_vm10 = vcmp.eq.f32.partialorder %v1009_v19, 8.507059e+37  ;;  %v4086_v19 = vld [vmem:[#allocation14_spill] sm:$0xff] }
 0x2f6   :  { %v1031_v58 = vor.u32 1.1754944e-38, %v1030_v46  ;;  %vm1029_vm11 = vcmp.eq.f32.partialorder %v1028_v54, 8.507059e+37  ;;  %v4085_v46 = vld [vmem:[#allocation13_spill] sm:$0xff] }
 0x2f7   :  { %v2690_v17 = vpop.eup %2689 }
 0x2f8   :  { %v1038_v45 = vadd.f32 1.0, %v2690_v17 }
 0x2f9   :  { %v2692_v63 = vpop.eup %2691 }
 0x2fa   :  { %v2694_v0 = vpop.eup %2693  ;;  %v1001_v11 = vmul.f32 %v2692_v63, %v999_v29  ;;  %2695 = vrcp.f32 %v1038_v45  ;;  %vm1006_vm4 = vweird.f32 %v2692_v63  ;;  %vm1044_vm13 = vweird.f32 %v1038_v45 }
 0x2fb   :  { %v1020_v18 = vmul.f32 %v2694_v0, %v1018_v36  ;;  %2697 = vtanh.f32 %v994_v24  ;;  %vm1025_vm5 = vweird.f32 %v2694_v0  ;;  %vm1007_vm8 = vmor %vm1005_vm6, %vm1006_vm4  ;;  %v1050_v24 = vand.u32 2147483648, %v1038_v45 }
 0x2fc   :  { %v1002_v28 = vsub.f32 1.0, %v1001_v11  ;;  %vm1026_vm9 = vmor %vm1024_vm7, %vm1025_vm5 }
 0x2fd   :  { %v1021_v6 = vsub.f32 1.0, %v1020_v18  ;;  %v1051_v18 = vor.u32 1.1754944e-38, %v1050_v24 }
 0x2fe   :  { %v1003_v12 = vmul.f32 %v2692_v63, %v1002_v28 }
 0x2ff   :  { %v1022_v27 = vmul.f32 %v2694_v0, %v1021_v6 }
 0x300   :  { %v2696_v57 = vpop.eup %2695  ;;  %v1004_v5 = vadd.f32 %v2692_v63, %v1003_v12 }
 0x301   :  { %v1023_v55 = vadd.f32 %v2694_v0, %v1022_v27  ;;  %v1040_v23 = vmul.f32 %v2696_v57, %v1038_v45  ;;  %v2698_v62 = vpop.eup %2697  ;;  %vm1045_vm12 = vweird.f32 %v2696_v57 }
 0x302   :  { %v1008_v31 = vsel %vm1007_vm8, %v2692_v63, %v1004_v5  ;;  %v1048_v63 = vand.u32 2147483647, %v1038_v45  ;;  %vm1046_vm14 = vmor %vm1044_vm13, %vm1045_vm12 }
 0x303   :  { %v1013_v40 = vsel %vm1010_vm10, %v1012_v25, %v1008_v31  ;;  %v1027_v42 = vsel %vm1026_vm9, %v2694_v0, %v1023_v55  ;;  %v1041_v30 = vsub.f32 1.0, %v1040_v23  ;;  %v4087_v55 = vld [vmem:[#allocation16_spill] sm:$0xff] }
 0x304   :  { %v1032_v16 = vsel %vm1029_vm11, %v1031_v58, %v1027_v42  ;;  %v1055_v39 = vmul.f32 %v2698_v62, %v1013_v40  ;;  %vm1049_vm15 = vcmp.eq.f32.partialorder %v1048_v63, 8.507059e+37  ;;  %v4088_v63 = vld [vmem:[#allocation15_spill] sm:$0xff] }
 0x305   :  { %v1054_v17 = vmul.f32 %v1032_v16, %v3566_v38  ;;  %v1042_v50 = vmul.f32 %v2696_v57, %v1041_v30 }
 0x307   :  { %v3608_v29 = vadd.f32 %v1055_v39, %v1054_v17  ;;  %v1043_v36 = vadd.f32 %v2696_v57, %v1042_v50 }
 0x309   :  { %2699 = vtanh.f32 %v3608_v29  ;;  %v1047_v11 = vsel %vm1046_vm14, %v2696_v57, %v1043_v36 }
 0x30a   :  { %v1052_v28 = vsel %vm1049_vm15, %v1051_v18, %v1047_v11 }
 0x30f   :  { %v2700_v0 = vpop.eup %2699 }
 0x310   :  { %v1058_v6 = vmul.f32 %v2700_v0, %v1052_v28 }
 0x312   :  { %v1059_v56 = vpack.c.bf16 %v1058_v6, %v1058_v6 }
 0x314   :  { %1068 = vmatmul.bf16.vlgmr.msrb.gmra.mxu0 %v1059_v56  ;;  %1081 = vmatmul.bf16.vlgmr.msrb.gmra.mxu1 %v1059_v56 }
 0x315   :  { %1094 = vmatmul.bf16.vlgmr.msrb.gmra.mxu2 %v1059_v56  ;;  %1107 = vmatmul.bf16.vlgmr.msrb.gmra.mxu3 %v1059_v56 }
 0x316   :  { %1300 = vmatpush.bf16.msrb.mxu0 %v3034_v37  ;;  %1313 = vmatpush.bf16.msrb.mxu1 %v3045_v41 }
 0x317   :  { %1326 = vmatpush.bf16.msrb.mxu2 %v3062_v47  ;;  %1339 = vmatpush.bf16.msrb.mxu3 %v3065_v48 }
 0x31a   :  { %1301 = vmatpush.bf16.msrb.mxu0 %v3067_v49  ;;  %1314 = vmatpush.bf16.msrb.mxu1 %v3079_v53 }
 0x31b   :  { %1327 = vmatpush.bf16.msrb.mxu2 %v3097_v59  ;;  %1340 = vmatpush.bf16.msrb.mxu3 %v3101_v60 }
 0x31e   :  { %1302 = vmatpush.bf16.msrb.mxu0 %v3103_v61  ;;  %1315 = vmatpush.bf16.msrb.mxu1 %v3115_v1 }
 0x31f   :  { %1328 = vmatpush.bf16.msrb.mxu2 %v3133_v7  ;;  %1341 = vmatpush.bf16.msrb.mxu3 %v3137_v8 }
 0x322   :  { %1303 = vmatpush.bf16.msrb.mxu0 %v3139_v9  ;;  %1316 = vmatpush.bf16.msrb.mxu1 %v3151_v13 }
 0x323   :  { %1329 = vmatpush.bf16.msrb.mxu2 %v3172_v20  ;;  %1342 = vmatpush.bf16.msrb.mxu3 %v3176_v21 }
 0x326   :  { %1304 = vmatpush.bf16.msrb.mxu0 %v3178_v22  ;;  %1317 = vmatpush.bf16.msrb.mxu1 %v3190_v26 }
 0x327   :  { %1330 = vmatpush.bf16.msrb.mxu2 %v3208_v32  ;;  %1343 = vmatpush.bf16.msrb.mxu3 %v3212_v33 }
 0x32a   :  { %1305 = vmatpush.bf16.msrb.mxu0 %v3214_v34  ;;  %1318 = vmatpush.bf16.msrb.mxu1 %v3217_v35 }
 0x32b   :  { %1331 = vmatpush.bf16.msrb.mxu2 %v3253_v52  ;;  %1344 = vmatpush.bf16.msrb.mxu3 %v3237_v43 }
 0x32e   :  { %1306 = vmatpush.bf16.msrb.mxu0 %v3239_v44  ;;  %1319 = vmatpush.bf16.msrb.mxu1 %v3251_v51 }
 0x32f   :  { %1332 = vmatpush.bf16.msrb.mxu2 %v3286_v4  ;;  %1345 = vmatpush.bf16.msrb.mxu3 %v3282_v2 }
 0x332   :  { %1307 = vmatpush.bf16.msrb.mxu0 %v3284_v3  ;;  %1320 = vmatpush.bf16.msrb.mxu1 %v3295_v10 }
 0x333   :  { %1333 = vmatpush.bf16.msrb.mxu2 %v3304_v14  ;;  %1346 = vmatpush.bf16.msrb.mxu3 %v3308_v15 }
 0x391   :  { %v1069_v38 = vpop.f32.mrf.mxu0  ;;  %v1082_v45 = vpop.f32.mrf.mxu1 }
 0x392   :  { %v1112_v12 = vadd.f32 %v1069_v38, %v4085_v46  ;;  %v1113_v27 = vadd.f32 %v1082_v45, %v4086_v19 }
 0x394   :  { %v2312_v54 = vmul.f32 -1.442695, %v1112_v12  ;;  %v2313_v57 = vmul.f32 -1.442695, %v1113_v27 }
 0x396   :  { %2701 = vpow2.f32 %v2312_v54 }
 0x397   :  { %2703 = vpow2.f32 %v2313_v57 }
 0x398   :  { %v1095_v5 = vpop.f32.mrf.mxu2  ;;  %v1108_v25 = vpop.f32.mrf.mxu3 }
 0x399   :  { %v1115_v23 = vadd.f32 %v1108_v25, %v4087_v55  ;;  %v1071_v58 = vpop.f32.mrf.mxu0  ;;  %v1084_v31 = vpop.f32.mrf.mxu1  ;;  %v1114_v11 = vadd.f32 %v1095_v5, %v4088_v63 }
 0x39b   :  { %v2314_v62 = vmul.f32 -1.442695, %v1115_v23 }
 0x39c   :  { %v2702_v40 = vpop.eup %2701 }
 0x39d   :  { %v2704_v42 = vpop.eup %2703  ;;  %v1119_v30 = vadd.f32 1.0, %v2702_v40  ;;  %2705 = vpow2.f32 %v2314_v62 }
 0x39e   :  { %v1138_v16 = vadd.f32 1.0, %v2704_v42 }
 0x39f   :  { %2707 = vrcp.f32 %v1119_v30  ;;  %v1131_v38 = vand.u32 2147483648, %v1119_v30  ;;  %v1129_v12 = vand.u32 2147483647, %v1119_v30  ;;  %vm1125_vm2 = vweird.f32 %v1119_v30 }
 0x3a0   :  { %2709 = vrcp.f32 %v1138_v16  ;;  %v1097_v39 = vpop.f32.mrf.mxu2  ;;  %v1110_v17 = vpop.f32.mrf.mxu3  ;;  %v1150_v45 = vand.u32 2147483648, %v1138_v16  ;;  %v1148_v27 = vand.u32 2147483647, %v1138_v16  ;;  %vm1144_vm3 = vweird.f32 %v1138_v16 }
 0x3a1   :  { %v1132_v5 = vor.u32 1.1754944e-38, %v1131_v38  ;;  %vm1130_vm6 = vcmp.eq.f32.partialorder %v1129_v12, 8.507059e+37 }
 0x3a2   :  { %v1151_v23 = vor.u32 1.1754944e-38, %v1150_v45  ;;  %vm1149_vm7 = vcmp.eq.f32.partialorder %v1148_v27, 8.507059e+37 }
 0x3a3   :  { %v2706_v50 = vpop.eup %2705 }
 0x3a4   :  { %v1158_v36 = vadd.f32 1.0, %v2706_v50 }
 0x3a5   :  { %v2708_v24 = vpop.eup %2707 }
 0x3a6   :  { %v2710_v18 = vpop.eup %2709  ;;  %v1121_v0 = vmul.f32 %v2708_v24, %v1119_v30  ;;  %2711 = vrcp.f32 %v1158_v36  ;;  %vm1126_vm0 = vweird.f32 %v2708_v24  ;;  %vm1164_vm9 = vweird.f32 %v1158_v36 }
 0x3a7   :  { %v1140_v28 = vmul.f32 %v2710_v18, %v1138_v16  ;;  %2713 = vtanh.f32 %v1114_v11  ;;  %vm1145_vm1 = vweird.f32 %v2710_v18  ;;  %vm1127_vm4 = vmor %vm1125_vm2, %vm1126_vm0  ;;  %v1170_v11 = vand.u32 2147483648, %v1158_v36 }
 0x3a8   :  { %v1122_v6 = vsub.f32 1.0, %v1121_v0  ;;  %vm1146_vm5 = vmor %vm1144_vm3, %vm1145_vm1 }
 0x3a9   :  { %v1141_v56 = vsub.f32 1.0, %v1140_v28  ;;  %v1171_v28 = vor.u32 1.1754944e-38, %v1170_v11 }
 0x3aa   :  { %v1123_v46 = vmul.f32 %v2708_v24, %v1122_v6 }
 0x3ab   :  { %v1142_v19 = vmul.f32 %v2710_v18, %v1141_v56 }
 0x3ac   :  { %v2712_v54 = vpop.eup %2711  ;;  %v1124_v57 = vadd.f32 %v2708_v24, %v1123_v46 }
 0x3ad   :  { %v1143_v25 = vadd.f32 %v2710_v18, %v1142_v19  ;;  %v1160_v55 = vmul.f32 %v2712_v54, %v1158_v36  ;;  %v2714_v31 = vpop.eup %2713  ;;  %vm1165_vm8 = vweird.f32 %v2712_v54 }
 0x3ae   :  { %v1128_v58 = vsel %vm1127_vm4, %v2708_v24, %v1124_v57  ;;  %v1168_v24 = vand.u32 2147483647, %v1158_v36  ;;  %vm1166_vm10 = vmor %vm1164_vm9, %vm1165_vm8 }
 0x3af   :  { %v1133_v62 = vsel %vm1130_vm6, %v1132_v5, %v1128_v58  ;;  %v1147_v40 = vsel %vm1146_vm5, %v2710_v18, %v1143_v25  ;;  %v1161_v42 = vsub.f32 1.0, %v1160_v55 }
 0x3b0   :  { %v1152_v39 = vsel %vm1149_vm7, %v1151_v23, %v1147_v40  ;;  %v1175_v17 = vmul.f32 %v2714_v31, %v1133_v62  ;;  %vm1169_vm11 = vcmp.eq.f32.partialorder %v1168_v24, 8.507059e+37 }
 0x3b1   :  { %v1174_v50 = vmul.f32 %v1152_v39, %v3608_v29  ;;  %v1162_v63 = vmul.f32 %v2712_v54, %v1161_v42 }
 0x3b3   :  { %v3648_v30 = vadd.f32 %v1175_v17, %v1174_v50  ;;  %v1163_v16 = vadd.f32 %v2712_v54, %v1162_v63 }
 0x3b5   :  { %2715 = vtanh.f32 %v3648_v30  ;;  %v1167_v0 = vsel %vm1166_vm10, %v2712_v54, %v1163_v16 }
 0x3b6   :  { %v1172_v6 = vsel %vm1169_vm11, %v1171_v28, %v1167_v0 }
 0x3bb   :  { %v2716_v18 = vpop.eup %2715 }
 0x3bc   :  { %v1178_v56 = vmul.f32 %v2716_v18, %v1172_v6 }
 0x3be   :  { %v1179_v38 = vpack.c.bf16 %v1178_v56, %v1178_v56 }
 0x3c0   :  { %1188 = vmatmul.bf16.vlgmr.msra.gmra.mxu0 %v1179_v38  ;;  %1201 = vmatmul.bf16.vlgmr.msra.gmra.mxu1 %v1179_v38 }
 0x3c1   :  { %1214 = vmatmul.bf16.vlgmr.msra.gmra.mxu2 %v1179_v38  ;;  %1227 = vmatmul.bf16.vlgmr.msra.gmra.mxu3 %v1179_v38  ;;  %v2617_v38 = vld [vmem:[%s4046_s4 + $0xec] sm:$0xf0] }
 0x3c2   :  { %1420 = vmatpush.bf16.msra.mxu0 %v3034_v37  ;;  %1433 = vmatpush.bf16.msra.mxu1 %v3045_v41 }
 0x3c3   :  { %1459 = vmatpush.bf16.msra.mxu3 %v3065_v48  ;;  %1446 = vmatpush.bf16.msra.mxu2 %v3062_v47  ;;  %v4089_v47 = vld [vmem:[#allocation17_spill] sm:$0xff] }
 0x3c6   :  { %1421 = vmatpush.bf16.msra.mxu0 %v3067_v49  ;;  %1434 = vmatpush.bf16.msra.mxu1 %v3079_v53  ;;  %v4090_v49 = vld [vmem:[#allocation18_spill] sm:$0xff] }
 0x3c7   :  { %1460 = vmatpush.bf16.msra.mxu3 %v3101_v60  ;;  %1447 = vmatpush.bf16.msra.mxu2 %v3097_v59 }
 0x3ca   :  { %1422 = vmatpush.bf16.msra.mxu0 %v3103_v61  ;;  %1435 = vmatpush.bf16.msra.mxu1 %v3115_v1 }
 0x3cb   :  { %1461 = vmatpush.bf16.msra.mxu3 %v3137_v8  ;;  %1448 = vmatpush.bf16.msra.mxu2 %v3133_v7  ;;  %v4091_v7 = vld [vmem:[#allocation20_spill] sm:$0xff] }
 0x3ce   :  { %1423 = vmatpush.bf16.msra.mxu0 %v3139_v9  ;;  %1436 = vmatpush.bf16.msra.mxu1 %v3151_v13 }
 0x3cf   :  { %1462 = vmatpush.bf16.msra.mxu3 %v3176_v21  ;;  %1449 = vmatpush.bf16.msra.mxu2 %v3172_v20 }
 0x3d2   :  { %1424 = vmatpush.bf16.msra.mxu0 %v3178_v22  ;;  %1437 = vmatpush.bf16.msra.mxu1 %v3190_v26 }
 0x3d3   :  { %1463 = vmatpush.bf16.msra.mxu3 %v3212_v33  ;;  %1450 = vmatpush.bf16.msra.mxu2 %v3208_v32 }
 0x3d6   :  { %1425 = vmatpush.bf16.msra.mxu0 %v3214_v34  ;;  %1438 = vmatpush.bf16.msra.mxu1 %v3217_v35 }
 0x3d7   :  { %1464 = vmatpush.bf16.msra.mxu3 %v3237_v43  ;;  %1451 = vmatpush.bf16.msra.mxu2 %v3253_v52 }
 0x3da   :  { %1426 = vmatpush.bf16.msra.mxu0 %v3239_v44  ;;  %1439 = vmatpush.bf16.msra.mxu1 %v3251_v51  ;;  %v4092_v51 = vld [vmem:[#allocation19_spill] sm:$0xff] }
 0x3db   :  { %1465 = vmatpush.bf16.msra.mxu3 %v3282_v2  ;;  %1452 = vmatpush.bf16.msra.mxu2 %v3286_v4 }
 0x3de   :  { %1427 = vmatpush.bf16.msra.mxu0 %v3284_v3  ;;  %1440 = vmatpush.bf16.msra.mxu1 %v3295_v10 }
 0x3df   :  { %1466 = vmatpush.bf16.msra.mxu3 %v3308_v15  ;;  %1453 = vmatpush.bf16.msra.mxu2 %v3304_v14 }
 0x43d   :  { %v1189_v37 = vpop.f32.mrf.mxu0  ;;  %v1202_v41 = vpop.f32.mrf.mxu1 }
 0x43e   :  { %v1232_v48 = vadd.f32 %v1189_v37, %v4089_v47  ;;  %v1233_v53 = vadd.f32 %v1202_v41, %v4090_v49  ;;  %v2615_v37 = vld [vmem:[%s4046_s4 + $0xe4] sm:$0xf]  ;;  %v2440_v47 = vld [vmem:[%s4046_s4 + $0xf0] sm:$0xf0]  ;;  %v2448_v49 = vld [vmem:[%s4046_s4 + $0xf8] sm:$0xf0] }
 0x440   :  { %v2315_v59 = vmul.f32 -1.442695, %v1232_v48  ;;  %v2316_v60 = vmul.f32 -1.442695, %v1233_v53  ;;  %v2616_v48 = vld [vmem:[%s4046_s4 + $0xec] sm:$0xf]  ;;  %v2443_v53 = vor.u32 %v2615_v37, %v2440_v47 }
 0x442   :  { %2717 = vpow2.f32 %v2315_v59  ;;  %v2451_v59 = vor.u32 %v2616_v48, %v2448_v49  ;;  %v2599_v49 = vld [vmem:[%s4046_s4 + $0x64] sm:$0xf] }
 0x443   :  { %2719 = vpow2.f32 %v2316_v60 }
 0x444   :  { %v1215_v61 = vpop.f32.mrf.mxu2  ;;  %v1228_v1 = vpop.f32.mrf.mxu3 }
 0x445   :  { %v1235_v8 = vadd.f32 %v1228_v1, %v4091_v7  ;;  %v1191_v9 = vpop.f32.mrf.mxu0  ;;  %v1204_v13 = vpop.f32.mrf.mxu1  ;;  %v1234_v52 = vadd.f32 %v1215_v61, %v4092_v51  ;;  %v4093_v1 = vld [vmem:[#allocation21_spill] sm:$0xff] }
 0x446   :  { %v2422_v13 = vld [vmem:[%s4046_s4 + $0xc0] sm:$0xf]  ;;  %v2446_v51 = vld [vmem:[%s4046_s4 + $0xe8] sm:$0xf] }
 0x447   :  { %v2317_v20 = vmul.f32 -1.442695, %v1235_v8  ;;  %v4094_v8 = vld [vmem:[#allocation22_spill] sm:$0xff] }
 0x448   :  { %v2718_v21 = vpop.eup %2717 }
 0x449   :  { %v2720_v22 = vpop.eup %2719  ;;  %v1239_v26 = vadd.f32 1.0, %v2718_v21  ;;  %2721 = vpow2.f32 %v2317_v20  ;;  %v2613_v20 = vld [vmem:[%s4046_s4 + $0xcc] sm:$0xf0]  ;;  %v2611_v21 = vld [vmem:[%s4046_s4 + $0xc4] sm:$0xf] }
 0x44a   :  { %v1258_v32 = vadd.f32 1.0, %v2720_v22  ;;  %v2423_v22 = vor.u32 %v2613_v20, %v2422_v13  ;;  %v2398_v20 = vld [vmem:[%s4046_s4 + $0x88] sm:$0xf] }
 0x44b   :  { %2723 = vrcp.f32 %v1239_v26  ;;  %v1251_v15 = vand.u32 2147483648, %v1239_v26  ;;  %v1249_v45 = vand.u32 2147483647, %v1239_v26  ;;  %vm1245_vm14 = vweird.f32 %v1239_v26 }
 0x44c   :  { %2725 = vrcp.f32 %v1258_v32  ;;  %v1217_v33 = vpop.f32.mrf.mxu2  ;;  %v1230_v34 = vpop.f32.mrf.mxu3  ;;  %v1270_v29 = vand.u32 2147483648, %v1258_v32  ;;  %v1268_v12 = vand.u32 2147483647, %v1258_v32  ;;  %vm1264_vm15 = vweird.f32 %v1258_v32 }
 0x44d   :  { %v1252_v54 = vor.u32 1.1754944e-38, %v1251_v15  ;;  %vm1250_vm2 = vcmp.eq.f32.partialorder %v1249_v45, 8.507059e+37  ;;  %v2432_v33 = vld [vmem:[%s4046_s4 + $0xd8] sm:$0xf0] }
 0x44e   :  { %v1271_v25 = vor.u32 1.1754944e-38, %v1270_v29  ;;  %vm1269_vm3 = vcmp.eq.f32.partialorder %v1268_v12, 8.507059e+37  ;;  %v2416_v45 = vld [vmem:[%s4046_s4 + $0xb8] sm:$0xf0] }
 0x44f   :  { %v2722_v35 = vpop.eup %2721 }
 0x450   :  { %v1278_v43 = vadd.f32 1.0, %v2722_v35 }
 0x451   :  { %v2724_v44 = vpop.eup %2723 }
 0x452   :  { %v2726_v2 = vpop.eup %2725  ;;  %v1241_v3 = vmul.f32 %v2724_v44, %v1239_v26  ;;  %2727 = vrcp.f32 %v1278_v43  ;;  %vm1246_vm12 = vweird.f32 %v2724_v44  ;;  %v1290_v16 = vand.u32 2147483648, %v1278_v43  ;;  %v2424_v26 = vld [vmem:[%s4046_s4 + $0xd0] sm:$0xf0] }
 0x453   :  { %v1260_v4 = vmul.f32 %v2726_v2, %v1258_v32  ;;  %2729 = vtanh.f32 %v1234_v52  ;;  %vm1265_vm13 = vweird.f32 %v2726_v2  ;;  %vm1247_vm0 = vmor %vm1245_vm14, %vm1246_vm12  ;;  %vm1284_vm5 = vweird.f32 %v1278_v43  ;;  %v2612_v32 = vld [vmem:[%s4046_s4 + $0xcc] sm:$0xf]  ;;  %v2618_v52 = vld [vmem:[%s4046_s4 + $0xf4] sm:$0xf0] }
 0x454   :  { %v1242_v10 = vsub.f32 1.0, %v1241_v3  ;;  %vm1266_vm1 = vmor %vm1264_vm15, %vm1265_vm13  ;;  %v1288_v11 = vand.u32 2147483647, %v1278_v43  ;;  %v1291_v0 = vor.u32 1.1754944e-38, %v1290_v16  ;;  %v2447_v3 = vor.u32 %v2618_v52, %v2446_v51  ;;  %v2596_v51 = vld [vmem:[%s4046_s4 + $0x4c] sm:$0xf] }
 0x455   :  { %v1261_v14 = vsub.f32 1.0, %v1260_v4  ;;  %v2609_v4 = vld [vmem:[%s4046_s4 + $0xac] sm:$0xf0]  ;;  %v2368_v52 = vld [vmem:[%s4046_s4 + $0x58] sm:$0xf0] }
 0x456   :  { %v1243_v36 = vmul.f32 %v2724_v44, %v1242_v10  ;;  %vm1289_vm7 = vcmp.eq.f32.partialorder %v1288_v11, 8.507059e+37  ;;  %v2607_v10 = vld [vmem:[%s4046_s4 + $0xa4] sm:$0xf] }
 0x457   :  { %v1262_v46 = vmul.f32 %v2726_v2, %v1261_v14  ;;  %v2408_v14 = vld [vmem:[%s4046_s4 + $0xb0] sm:$0xf0] }
 0x458   :  { %v2728_v19 = vpop.eup %2727  ;;  %v1244_v27 = vadd.f32 %v2724_v44, %v1243_v36  ;;  %v2411_v29 = vor.u32 %v2607_v10, %v2408_v14  ;;  %v2608_v36 = vld [vmem:[%s4046_s4 + $0xac] sm:$0xf]  ;;  %v2602_v10 = vld [vmem:[%s4046_s4 + $0x74] sm:$0xf0]  ;;  %v2342_v14 = vld [vmem:[%s4046_s4 + $0x20] sm:$0xf] }
 0x459   :  { %v1263_v57 = vadd.f32 %v2726_v2, %v1262_v46  ;;  %v1280_v5 = vmul.f32 %v2728_v19, %v1278_v43  ;;  %v2730_v23 = vpop.eup %2729  ;;  %vm1285_vm4 = vweird.f32 %v2728_v19  ;;  %v2427_v43 = vor.u32 %v2611_v21, %v2424_v26  ;;  %v2430_v46 = vld [vmem:[%s4046_s4 + $0xc8] sm:$0xf]  ;;  %v2606_v21 = vld [vmem:[%s4046_s4 + $0x94] sm:$0xf0] }
 0x45a   :  { %v1248_v55 = vsel %vm1247_vm0, %v2724_v44, %v1244_v27  ;;  %vm1286_vm6 = vmor %vm1284_vm5, %vm1285_vm4  ;;  %v2435_v44 = vor.u32 %v2612_v32, %v2432_v33  ;;  %v2419_v27 = vor.u32 %v2608_v36, %v2416_v45  ;;  %v2399_v32 = vor.u32 %v2606_v21, %v2398_v20  ;;  %v2597_v33 = vld [vmem:[%s4046_s4 + $0x4c] sm:$0xf0] }
 0x45b   :  { %v1253_v58 = vsel %vm1250_vm2, %v1252_v54, %v1248_v55  ;;  %v1267_v31 = vsel %vm1266_vm1, %v2726_v2, %v1263_v57  ;;  %v1281_v62 = vsub.f32 1.0, %v1280_v5  ;;  %v2406_v2 = vld [vmem:[%s4046_s4 + $0xa0] sm:$0xf]  ;;  %v2614_v54 = vld [vmem:[%s4046_s4 + $0xd4] sm:$0xf0] }
 0x45c   :  { %v1272_v40 = vsel %vm1269_vm3, %v1271_v25, %v1267_v31  ;;  %v1295_v42 = vmul.f32 %v2730_v23, %v1253_v58  ;;  %v2407_v15 = vor.u32 %v2609_v4, %v2406_v2  ;;  %v2390_v57 = vld [vmem:[%s4046_s4 + $0x80] sm:$0xf]  ;;  %v2605_v5 = vld [vmem:[%s4046_s4 + $0x8c] sm:$0xf0]  ;;  %v2431_v31 = vor.u32 %v2614_v54, %v2430_v46  ;;  %v2382_v4 = vld [vmem:[%s4046_s4 + $0x68] sm:$0xf] }
 0x45d   :  { %v1294_v39 = vmul.f32 %v1272_v40, %v3648_v30  ;;  %v1282_v17 = vmul.f32 %v2728_v19, %v1281_v62  ;;  %v2438_v30 = vld [vmem:[%s4046_s4 + $0xe0] sm:$0xf]  ;;  %v2391_v62 = vor.u32 %v2605_v5, %v2390_v57  ;;  %v2603_v40 = vld [vmem:[%s4046_s4 + $0x84] sm:$0xf]  ;;  %v2593_v45 = vld [vmem:[%s4046_s4 + $0x2c] sm:$0xf0] }
 0x45e   :  { %v2439_v41 = vor.u32 %v2617_v38, %v2438_v30  ;;  %v4095_v25 = vld [vmem:[#allocation24_spill] sm:$0xff]  ;;  %v2344_v57 = vld [vmem:[%s4046_s4 + $0x30] sm:$0xf0] }
 0x45f   :  { %v3688_v50 = vadd.f32 %v1295_v42, %v1294_v39  ;;  %v1283_v63 = vadd.f32 %v2728_v19, %v1282_v17  ;;  %v2392_v42 = vld [vmem:[%s4046_s4 + $0x90] sm:$0xf0]  ;;  %v2604_v39 = vld [vmem:[%s4046_s4 + $0x8c] sm:$0xf]  ;;  %v2374_v30 = vld [vmem:[%s4046_s4 + $0x60] sm:$0xf] }
 0x460   :  { %v2395_v17 = vor.u32 %v2603_v40, %v2392_v42  ;;  %v2591_v54 = vld [vmem:[%s4046_s4 + $0x24] sm:$0xf]  ;;  %v2352_v40 = vld [vmem:[%s4046_s4 + $0x38] sm:$0xf0]  ;;  %v2366_v42 = vld [vmem:[%s4046_s4 + $0x48] sm:$0xf] }
 0x461   :  { %2731 = vtanh.f32 %v3688_v50  ;;  %v1287_v24 = vsel %vm1286_vm6, %v2728_v19, %v1283_v63  ;;  %v2400_v63 = vld [vmem:[%s4046_s4 + $0x98] sm:$0xf0] }
 0x462   :  { %v1292_v18 = vsel %vm1289_vm7, %v1291_v0, %v1287_v24  ;;  %v2403_v11 = vor.u32 %v2604_v39, %v2400_v63  ;;  %v2598_v39 = vld [vmem:[%s4046_s4 + $0x54] sm:$0xf0] }
 0x467   :  { %v2732_v28 = vpop.eup %2731 }
 0x468   :  { %v1298_v6 = vmul.f32 %v2732_v28, %v1292_v18 }
 0x46a   :  { %v1299_v56 = vpack.c.bf16 %v1298_v6, %v1298_v6  ;;  %v2414_v6 = vld [vmem:[%s4046_s4 + $0xa8] sm:$0xf] }
 0x46c   :  { %1308 = vmatmul.bf16.vlgmr.msrb.gmra.mxu0 %v1299_v56  ;;  %1321 = vmatmul.bf16.vlgmr.msrb.gmra.mxu1 %v1299_v56 }
 0x46d   :  { %1334 = vmatmul.bf16.vlgmr.msrb.gmra.mxu2 %v1299_v56  ;;  %1347 = vmatmul.bf16.vlgmr.msrb.gmra.mxu3 %v1299_v56  ;;  %v2610_v56 = vld [vmem:[%s4046_s4 + $0xb4] sm:$0xf0] }
 0x46e   :  { %1747 = vmatpush.bf16.msrb.mxu0 %v2439_v41  ;;  %1760 = vmatpush.bf16.msrb.mxu1 %v2443_v53  ;;  %v2601_v41 = vld [vmem:[%s4046_s4 + $0x6c] sm:$0xf0]  ;;  %v2415_v47 = vor.u32 %v2610_v56, %v2414_v6  ;;  %v2376_v53 = vld [vmem:[%s4046_s4 + $0x70] sm:$0xf0] }
 0x46f   :  { %1786 = vmatpush.bf16.msrb.mxu3 %v2451_v59  ;;  %1773 = vmatpush.bf16.msrb.mxu2 %v2447_v3  ;;  %v2375_v48 = vor.u32 %v2601_v41, %v2374_v30  ;;  %v2336_v41 = vld [vmem:[%s4046_s4 + $0x18] sm:$0xf0] }
 0x472   :  { %1748 = vmatpush.bf16.msrb.mxu0 %v2423_v22  ;;  %1761 = vmatpush.bf16.msrb.mxu1 %v2427_v43  ;;  %v2358_v22 = vld [vmem:[%s4046_s4 + $0x40] sm:$0xf] }
 0x473   :  { %1787 = vmatpush.bf16.msrb.mxu3 %v2435_v44  ;;  %1774 = vmatpush.bf16.msrb.mxu2 %v2431_v31  ;;  %v2359_v43 = vor.u32 %v2597_v33, %v2358_v22  ;;  %v2360_v44 = vld [vmem:[%s4046_s4 + $0x50] sm:$0xf0] }
 0x476   :  { %1749 = vmatpush.bf16.msrb.mxu0 %v2407_v15  ;;  %1762 = vmatpush.bf16.msrb.mxu1 %v2411_v29 }
 0x477   :  { %1788 = vmatpush.bf16.msrb.mxu3 %v2419_v27  ;;  %1775 = vmatpush.bf16.msrb.mxu2 %v2415_v47  ;;  %v2383_v27 = vor.u32 %v2602_v10, %v2382_v4 }
 0x47a   :  { %1750 = vmatpush.bf16.msrb.mxu0 %v2391_v62  ;;  %1763 = vmatpush.bf16.msrb.mxu1 %v2395_v17  ;;  %v2347_v62 = vor.u32 %v2591_v54, %v2344_v57  ;;  %v4102_v57 = vld [vmem:[#allocation26_spill] sm:$0xff] }
 0x47b   :  { %1789 = vmatpush.bf16.msrb.mxu3 %v2403_v11  ;;  %1776 = vmatpush.bf16.msrb.mxu2 %v2399_v32  ;;  %v2326_v11 = vld [vmem:[%s4046_s4] sm:$0xf] }
 0x47e   :  { %1751 = vmatpush.bf16.msrb.mxu0 %v2375_v48 }
 0x47f   :  { %1777 = vmatpush.bf16.msrb.mxu2 %v2383_v27  ;;  %v4101_v27 = vld [vmem:[#allocation25_spill] sm:$0xff] }
 0x482   :  { %1752 = vmatpush.bf16.msrb.mxu0 %v2359_v43 }
 0x4e9   :  { %v1309_v60 = vpop.f32.mrf.mxu0  ;;  %v1322_v61 = vpop.f32.mrf.mxu1 }
 0x4ea   :  { %v1352_v7 = vadd.f32 %v1309_v60, %v4093_v1  ;;  %v1353_v9 = vadd.f32 %v1322_v61, %v4094_v8  ;;  %v2379_v60 = vor.u32 %v2599_v49, %v2376_v53  ;;  %v2600_v61 = vld [vmem:[%s4046_s4 + $0x6c] sm:$0xf]  ;;  %v2384_v1 = vld [vmem:[%s4046_s4 + $0x78] sm:$0xf0] }
 0x4eb   :  { %v4096_v8 = vld [vmem:[#allocation23_spill] sm:$0xff]  ;;  %v2387_v13 = vor.u32 %v2600_v61, %v2384_v1  ;;  %v2350_v1 = vld [vmem:[%s4046_s4 + $0x28] sm:$0xf] }
 0x4ec   :  { %v2318_v34 = vmul.f32 -1.442695, %v1352_v7  ;;  %v2319_v35 = vmul.f32 -1.442695, %v1353_v9  ;;  %1764 = vmatpush.bf16.msrb.mxu1 %v2379_v60 }
 0x4ed   :  { %1790 = vmatpush.bf16.msrb.mxu3 %v2387_v13 }
 0x4ee   :  { %2733 = vpow2.f32 %v2318_v34  ;;  %v2595_v34 = vld [vmem:[%s4046_s4 + $0x44] sm:$0xf] }
 0x4ef   :  { %2735 = vpow2.f32 %v2319_v35 }
 0x4f0   :  { %v1335_v12 = vpop.f32.mrf.mxu2  ;;  %v1348_v19 = vpop.f32.mrf.mxu3 }
 0x4f1   :  { %v1355_v55 = vadd.f32 %v1348_v19, %v4095_v25  ;;  %v1311_v23 = vpop.f32.mrf.mxu0  ;;  %v1324_v58 = vpop.f32.mrf.mxu1  ;;  %v1354_v9 = vadd.f32 %v1335_v12, %v4096_v8  ;;  %v2363_v12 = vor.u32 %v2595_v34, %v2360_v44  ;;  %v2371_v19 = vor.u32 %v2596_v51, %v2368_v52  ;;  %v2334_v34 = vld [vmem:[%s4046_s4 + $0x8] sm:$0xf]  ;;  %v2634_v25 = vld [vmem:[%s4047_s6 + $0x78] sm:$0xff] }
 0x4f2   :  { %v2343_v23 = vor.u32 %v2593_v45, %v2342_v14  ;;  %v2592_v58 = vld [vmem:[%s4046_s4 + $0x2c] sm:$0xf] }
 0x4f3   :  { %v2320_v16 = vmul.f32 -1.442695, %v1355_v55  ;;  %1765 = vmatpush.bf16.msrb.mxu1 %v2363_v12  ;;  %1791 = vmatpush.bf16.msrb.mxu3 %v2371_v19  ;;  %v2355_v63 = vor.u32 %v2592_v58, %v2352_v40  ;;  %v2624_v45 = vld [vmem:[%s4047_s6 + $0x28] sm:$0xff] }
 0x4f4   :  { %v2734_v24 = vpop.eup %2733  ;;  %1753 = vmatpush.bf16.msrb.mxu0 %v2343_v23 }
 0x4f5   :  { %v2736_v0 = vpop.eup %2735  ;;  %v3778_v28 = vadd.f32 1.0, %v2734_v24  ;;  %2737 = vpow2.f32 %v2320_v16  ;;  %v2367_v16 = vor.u32 %v2598_v39, %v2366_v42  ;;  %v2589_v24 = vld [vmem:[%s4046_s4 + $0xc] sm:$0xf0]  ;;  %v4103_v39 = vld [vmem:[#allocation28_spill] sm:$0xff] }
 0x4f6   :  { %v3780_v18 = vadd.f32 1.0, %v2736_v0  ;;  %v2587_v0 = vld [vmem:[%s4046_s4 + $0x4] sm:$0xf]  ;;  %v2327_v30 = vor.u32 %v2589_v24, %v2326_v11  ;;  %v2632_v11 = vld [vmem:[%s4047_s6 + $0x68] sm:$0xff] }
 0x4f7   :  { %2739 = vrcp.f32 %v3778_v28  ;;  %v1369_v59 = vand.u32 2147483647, %v3778_v28  ;;  %v1371_v36 = vand.u32 2147483648, %v3778_v28  ;;  %vm1365_vm12 = vweird.f32 %v3778_v28  ;;  %1766 = vmatpush.bf16.msrb.mxu1 %v2347_v62  ;;  %1792 = vmatpush.bf16.msrb.mxu3 %v2355_v63  ;;  %v2621_v62 = vld [vmem:[%s4047_s6 + $0x10] sm:$0xff]  ;;  %v2620_v24 = vld [vmem:[%s4047_s6 + $0x8] sm:$0xff] }
 0x4f8   :  { %2741 = vrcp.f32 %v3780_v18  ;;  %v1337_v38 = vpop.f32.mrf.mxu2  ;;  %v1350_v37 = vpop.f32.mrf.mxu3  ;;  %v1390_v29 = vand.u32 2147483648, %v3780_v18  ;;  %v1388_v55 = vand.u32 2147483647, %v3780_v18  ;;  %vm1384_vm11 = vweird.f32 %v3780_v18  ;;  %1778 = vmatpush.bf16.msrb.mxu2 %v2367_v16  ;;  %1754 = vmatpush.bf16.msrb.mxu0 %v2327_v30 }
 0x4f9   :  { %vm3865_vm8 = vcmp.eq.f32.partialorder %v1369_v59, 8.507059e+37  ;;  %v2328_v38 = vld [vmem:[%s4046_s4 + $0x10] sm:$0xf0]  ;;  %v2588_v37 = vld [vmem:[%s4046_s4 + $0xc] sm:$0xf] }
 0x4fa   :  { %v1391_v48 = vor.u32 1.1754944e-38, %v1390_v29  ;;  %vm1389_vm15 = vcmp.eq.f32.partialorder %v1388_v55, 8.507059e+37  ;;  %v2331_v60 = vor.u32 %v2587_v0, %v2328_v38  ;;  %v2339_v61 = vor.u32 %v2588_v37, %v2336_v41  ;;  %v1544_v29 = vld [vmem:[%s4044_s0 + $0x1c] sm:$0xf] }
 0x4fb   :  { %v2738_v7 = vpop.eup %2737  ;;  %v2622_v55 = vld [vmem:[%s4047_s6 + $0x18] sm:$0xff] }
 0x4fc   :  { %v3819_v26 = vadd.f32 1.0, %v2738_v7  ;;  %v2594_v7 = vld [vmem:[%s4046_s4 + $0x34] sm:$0xf0]  ;;  %1767 = vmatpush.bf16.msrb.mxu1 %v2331_v60  ;;  %1793 = vmatpush.bf16.msrb.mxu3 %v2339_v61 }
 0x4fd   :  { %v3827_v35 = vpop.eup %2739  ;;  %v2351_v20 = vor.u32 %v2594_v7, %v2350_v1  ;;  %v2630_v1 = vld [vmem:[%s4047_s6 + $0x58] sm:$0xff] }
 0x4fe   :  { %v3838_v2 = vpop.eup %2741  ;;  %v1361_v3 = vmul.f32 %v3827_v35, %v3778_v28  ;;  %2743 = vrcp.f32 %v3819_v26  ;;  %vm1366_vm9 = vweird.f32 %v3827_v35  ;;  %vm1404_vm1 = vweird.f32 %v3819_v26 }
 0x4ff   :  { %v1380_v15 = vmul.f32 %v3838_v2, %v3780_v18  ;;  %2745 = vtanh.f32 %v1354_v9  ;;  %vm1385_vm10 = vweird.f32 %v3838_v2  ;;  %vm1367_vm13 = vmor %vm1365_vm12, %vm1366_vm9  ;;  %v1372_v18 = vor.u32 1.1754944e-38, %v1371_v36  ;;  %1779 = vmatpush.bf16.msrb.mxu2 %v2351_v20  ;;  %v2625_v36 = vld [vmem:[%s4047_s6 + $0x30] sm:$0xff] }
 0x500   :  { %v1362_v46 = vsub.f32 1.0, %v1361_v3  ;;  %vm3913_vm14 = vmor %vm1384_vm11, %vm1385_vm10  ;;  %v1408_v52 = vand.u32 2147483647, %v3819_v26 }
 0x501   :  { %v1381_v5 = vsub.f32 1.0, %v1380_v15 }
 0x502   :  { %v1363_v31 = vmul.f32 %v3827_v35, %v1362_v46  ;;  %vm1409_vm3 = vcmp.eq.f32.partialorder %v1408_v52, 8.507059e+37  ;;  %v2623_v46 = vld [vmem:[%s4047_s6 + $0x20] sm:$0xff] }
 0x503   :  { %v1382_v17 = vmul.f32 %v3838_v2, %v1381_v5 }
 0x504   :  { %v2744_v6 = vpop.eup %2743  ;;  %v1364_v56 = vadd.f32 %v3827_v35, %v1363_v31  ;;  %v2633_v31 = vld [vmem:[%s4047_s6 + $0x70] sm:$0xff] }
 0x505   :  { %v2746_v47 = vpop.eup %2745  ;;  %v1383_v28 = vadd.f32 %v3838_v2, %v1382_v17  ;;  %v1400_v49 = vmul.f32 %v2744_v6, %v3819_v26  ;;  %vm1405_vm0 = vweird.f32 %v2744_v6 }
 0x506   :  { %v1368_v59 = vsel %vm1367_vm13, %v3827_v35, %v1364_v56  ;;  %v2590_v35 = vld [vmem:[%s4046_s4 + $0x14] sm:$0xf0]  ;;  %vm1406_vm2 = vmor %vm1404_vm1, %vm1405_vm0 }
 0x507   :  { %v1373_v8 = vsel %vm3865_vm8, %v1372_v18, %v1368_v59  ;;  %v1387_v9 = vsel %vm3913_vm14, %v3838_v2, %v1383_v28  ;;  %v1401_v13 = vsub.f32 1.0, %v1400_v49  ;;  %v2335_v44 = vor.u32 %v2590_v35, %v2334_v34  ;;  %v2619_v18 = vld [vmem:[%s4047_s6] sm:$0xff]  ;;  %v2629_v35 = vld [vmem:[%s4047_s6 + $0x50] sm:$0xff] }
 0x508   :  { %v1392_v21 = vsel %vm1389_vm15, %v1391_v48, %v1387_v9  ;;  %v1415_v22 = vmul.f32 %v2746_v47, %v1373_v8  ;;  %v2631_v48 = vld [vmem:[%s4047_s6 + $0x60] sm:$0xff]  ;;  %v4104_v8 = vld [vmem:[#allocation27_spill] sm:$0xff] }
 0x509   :  { %v1414_v32 = vmul.f32 %v1392_v21, %v3688_v50  ;;  %v1402_v33 = vmul.f32 %v2744_v6, %v1401_v13  ;;  %v1410_v50 = vand.u32 2147483648, %v3819_v26  ;;  %1780 = vmatpush.bf16.msrb.mxu2 %v2335_v44  ;;  %v2626_v26 = vld [vmem:[%s4047_s6 + $0x38] sm:$0xff] }
 0x50b   :  { %v3936_v43 = vadd.f32 %v1415_v22, %v1414_v32  ;;  %v1403_v51 = vadd.f32 %v2744_v6, %v1402_v33  ;;  %v1411_v3 = vor.u32 1.1754944e-38, %v1410_v50 }
 0x50d   :  { %2747 = vtanh.f32 %v3936_v43  ;;  %v1407_v2 = vsel %vm1406_vm2, %v2744_v6, %v1403_v51  ;;  %v3981_v6 = vld [vmem:[%s4048_s5] sm:$0xf] }
 0x50e   :  { %v1412_v10 = vsel %vm1409_vm3, %v1411_v3, %v1407_v2  ;;  %v1579_v41 = vperm.slane %v3981_v6, 0  ;;  %v1580_v47 = vperm.slane %v3981_v6, 1  ;;  %v1582_v32 = vperm.slane %v3981_v6, 3  ;;  %v2628_v3 = vld [vmem:[%s4047_s6 + $0x48] sm:$0xff] }
 0x513   :  { %v2748_v4 = vpop.eup %2747 }
 0x514   :  { %v1418_v14 = vmul.f32 %v2748_v4, %v1412_v10 }
 0x516   :  { %v1419_v15 = vpack.c.bf16 %v1418_v14, %v1418_v14 }
 0x518   :  { %1428 = vmatmul.bf16.vlgmr.msra.gmra.mxu0 %v1419_v15  ;;  %1441 = vmatmul.bf16.vlgmr.msra.gmra.mxu1 %v1419_v15 }
 0x519   :  { %1454 = vmatmul.bf16.vlgmr.msra.gmra.mxu2 %v1419_v15  ;;  %1467 = vmatmul.bf16.vlgmr.msra.gmra.mxu3 %v1419_v15 }
 0x51a   :  { %2005 = vmatpush.bf16.msra.mxu1 %v2626_v26  ;;  %1944 = vmatpush.bf16.msra.mxu0 %v2634_v25 }
 0x51e   :  { %2006 = vmatpush.bf16.msra.mxu1 %v2625_v36  ;;  %1945 = vmatpush.bf16.msra.mxu0 %v2633_v31 }
 0x522   :  { %2007 = vmatpush.bf16.msra.mxu1 %v2624_v45  ;;  %1946 = vmatpush.bf16.msra.mxu0 %v2632_v11 }
 0x526   :  { %2008 = vmatpush.bf16.msra.mxu1 %v2623_v46  ;;  %1947 = vmatpush.bf16.msra.mxu0 %v2631_v48 }
 0x528   :  { %1755 = vmatmul.bf16.vlgmr.msrb.gmra.mxu0 %v1544_v29  ;;  %1768 = vmatmul.bf16.vlgmr.msrb.gmra.mxu1 %v1544_v29 }
 0x529   :  { %1794 = vmatmul.bf16.vlgmr.msrb.gmra.mxu3 %v1544_v29  ;;  %1781 = vmatmul.bf16.vlgmr.msrb.gmra.mxu2 %v1544_v29 }
 0x52a   :  { %2009 = vmatpush.bf16.msra.mxu1 %v2622_v55  ;;  %1948 = vmatpush.bf16.msra.mxu0 %v2630_v1 }
 0x52e   :  { %2010 = vmatpush.bf16.msra.mxu1 %v2621_v62  ;;  %1949 = vmatpush.bf16.msra.mxu0 %v2629_v35 }
 0x532   :  { %2011 = vmatpush.bf16.msra.mxu1 %v2620_v24  ;;  %1950 = vmatpush.bf16.msra.mxu0 %v2628_v3 }
 0x536   :  { %2012 = vmatpush.bf16.msra.mxu1 %v2619_v18 }
 0x595   :  { %v1429_v12 = vpop.f32.mrf.mxu0  ;;  %v1442_v19 = vpop.f32.mrf.mxu1 }
 0x596   :  { %v1472_v54 = vadd.f32 %v1429_v12, %v4101_v27  ;;  %v1473_v5 = vadd.f32 %v1442_v19, %v4102_v57 }
 0x598   :  { %v2321_v23 = vmul.f32 -1.442695, %v1472_v54  ;;  %v2322_v58 = vmul.f32 -1.442695, %v1473_v5  ;;  %v2627_v54 = vld [vmem:[%s4047_s6 + $0x40] sm:$0xff] }
 0x599   :  { %1951 = vmatpush.bf16.msra.mxu0 %v2627_v54 }
 0x59a   :  { %2749 = vpow2.f32 %v2321_v23 }
 0x59b   :  { %2751 = vpow2.f32 %v2322_v58 }
 0x59c   :  { %v1455_v40 = vpop.f32.mrf.mxu2  ;;  %v1468_v42 = vpop.f32.mrf.mxu3 }
 0x59d   :  { %v1475_v17 = vadd.f32 %v1468_v42, %v4103_v39  ;;  %v1431_v63 = vpop.f32.mrf.mxu0  ;;  %v1444_v16 = vpop.f32.mrf.mxu1  ;;  %v1474_v9 = vadd.f32 %v1455_v40, %v4104_v8 }
 0x59f   :  { %v2323_v0 = vmul.f32 -1.442695, %v1475_v17 }
 0x5a0   :  { %v2750_v56 = vpop.eup %2749 }
 0x5a1   :  { %v2752_v30 = vpop.eup %2751  ;;  %v3983_v38 = vadd.f32 1.0, %v2750_v56  ;;  %2753 = vpow2.f32 %v2323_v0 }
 0x5a2   :  { %v3985_v37 = vadd.f32 1.0, %v2752_v30 }
 0x5a3   :  { %2755 = vrcp.f32 %v3983_v38  ;;  %v1489_v50 = vand.u32 2147483647, %v3983_v38  ;;  %v1491_v10 = vand.u32 2147483648, %v3983_v38  ;;  %vm1485_vm7 = vweird.f32 %v3983_v38 }
 0x5a4   :  { %2757 = vrcp.f32 %v3985_v37  ;;  %v1457_v28 = vpop.f32.mrf.mxu2  ;;  %v1470_v49 = vpop.f32.mrf.mxu3  ;;  %v1510_v26 = vand.u32 2147483648, %v3985_v37  ;;  %v1508_v45 = vand.u32 2147483647, %v3985_v37  ;;  %vm1504_vm6 = vweird.f32 %v3985_v37 }
 0x5a5   :  { %v1756_v53 = vpop.f32.mrf.mxu0  ;;  %v1769_v59 = vpop.f32.mrf.mxu1  ;;  %v1492_v5 = vor.u32 1.1754944e-38, %v1491_v10  ;;  %vm1490_vm10 = vcmp.eq.f32.partialorder %v1489_v50, 8.507059e+37 }
 0x5a6   :  { %v1757_v60 = vadd.f32 %v1756_v53, %v1579_v41  ;;  %v1770_v61 = vadd.f32 %v1769_v59, %v1580_v47  ;;  %v1511_v58 = vor.u32 1.1754944e-38, %v1510_v26  ;;  %vm1509_vm11 = vcmp.eq.f32.partialorder %v1508_v45, 8.507059e+37 }
 0x5a7   :  { %v2754_v7 = vpop.eup %2753 }
 0x5a8   :  { %v4001_v13 = vadd.f32 1.0, %v2754_v7  ;;  %v2452_v20 = vmul.f32 -1.442695, %v1757_v60  ;;  %v2453_v22 = vmul.f32 -1.442695, %v1770_v61 }
 0x5a9   :  { %v2756_v21 = vpop.eup %2755 }
 0x5aa   :  { %v2758_v33 = vpop.eup %2757  ;;  %v1481_v34 = vmul.f32 %v2756_v21, %v3983_v38  ;;  %2759 = vrcp.f32 %v4001_v13  ;;  %vm1486_vm4 = vweird.f32 %v2756_v21  ;;  %v1581_v38 = vperm.slane %v3981_v6, 2 }
 0x5ab   :  { %v1500_v44 = vmul.f32 %v2758_v33, %v3985_v37  ;;  %2761 = vtanh.f32 %v1474_v9  ;;  %vm1505_vm5 = vweird.f32 %v2758_v33  ;;  %vm1487_vm8 = vmor %vm1485_vm7, %vm1486_vm4  ;;  %v1530_v18 = vand.u32 2147483648, %v4001_v13 }
 0x5ac   :  { %v1482_v51 = vsub.f32 1.0, %v1481_v34  ;;  %2763 = vpow2.f32 %v2452_v20  ;;  %v1795_v52 = vpop.f32.mrf.mxu3  ;;  %v1782_v2 = vpop.f32.mrf.mxu2  ;;  %vm1506_vm9 = vmor %vm1504_vm6, %vm1505_vm5  ;;  %vm1524_vm13 = vweird.f32 %v4001_v13  ;;  %v1528_v49 = vand.u32 2147483647, %v4001_v13 }
 0x5ad   :  { %v1501_v4 = vsub.f32 1.0, %v1500_v44  ;;  %2765 = vpow2.f32 %v2453_v22  ;;  %v1796_v14 = vadd.f32 %v1795_v52, %v1582_v32  ;;  %v1758_v15 = vpop.f32.mrf.mxu0  ;;  %v1771_v29 = vpop.f32.mrf.mxu1  ;;  %v1783_v28 = vadd.f32 %v1782_v2, %v1581_v38 }
 0x5ae   :  { %v1483_v36 = vmul.f32 %v2756_v21, %v1482_v51  ;;  %v1531_v60 = vor.u32 1.1754944e-38, %v1530_v18  ;;  %vm1529_vm15 = vcmp.eq.f32.partialorder %v1528_v49, 8.507059e+37 }
 0x5af   :  { %v1502_v46 = vmul.f32 %v2758_v33, %v1501_v4  ;;  %v2454_v12 = vmul.f32 -1.442695, %v1796_v14 }
 0x5b0   :  { %v2760_v19 = vpop.eup %2759  ;;  %v1484_v27 = vadd.f32 %v2756_v21, %v1483_v36 }
 0x5b1   :  { %v2762_v57 = vpop.eup %2761  ;;  %v1503_v25 = vadd.f32 %v2758_v33, %v1502_v46  ;;  %v1520_v55 = vmul.f32 %v2760_v19, %v4001_v13  ;;  %2767 = vpow2.f32 %v2454_v12  ;;  %vm1525_vm12 = vweird.f32 %v2760_v19 }
 0x5b2   :  { %v2764_v23 = vpop.eup %2763  ;;  %v1488_v31 = vsel %vm1487_vm8, %v2756_v21, %v1484_v27  ;;  %vm1526_vm14 = vmor %vm1524_vm13, %vm1525_vm12 }
 0x5b3   :  { %v2766_v62 = vpop.eup %2765  ;;  %v1493_v40 = vsel %vm1490_vm10, %v1492_v5, %v1488_v31  ;;  %v1507_v42 = vsel %vm1506_vm9, %v2758_v33, %v1503_v25  ;;  %v1521_v39 = vsub.f32 1.0, %v1520_v55  ;;  %v1802_v17 = vadd.f32 1.0, %v2764_v23 }
 0x5b4   :  { %v1512_v63 = vsel %vm1509_vm11, %v1511_v58, %v1507_v42  ;;  %v1535_v16 = vmul.f32 %v2762_v57, %v1493_v40  ;;  %v1821_v11 = vadd.f32 1.0, %v2766_v62  ;;  %v1797_v24 = vpop.f32.mrf.mxu3  ;;  %v1784_v0 = vpop.f32.mrf.mxu2  ;;  %v2636_v40 = vld [vmem:[%s4049_s7] ss:$0 sm:$0xff] }
 0x5b5   :  { %v1534_v56 = vmul.f32 %v1512_v63, %v3936_v43  ;;  %v1522_v30 = vmul.f32 %v2760_v19, %v1521_v39  ;;  %2769 = vrcp.f32 %v1802_v17  ;;  %v1814_v20 = vand.u32 2147483648, %v1802_v17 }
 0x5b6   :  { %2771 = vrcp.f32 %v1821_v11  ;;  %v1833_v9 = vand.u32 2147483648, %v1821_v11  ;;  %v1812_v13 = vand.u32 2147483647, %v1802_v17  ;;  %v1831_v44 = vand.u32 2147483647, %v1821_v11 }
 0x5b7   :  { %v2768_v37 = vpop.eup %2767  ;;  %v1536_v41 = vadd.f32 %v1535_v16, %v1534_v56  ;;  %v1523_v48 = vadd.f32 %v2760_v19, %v1522_v30  ;;  %vm1808_vm2 = vweird.f32 %v1802_v17  ;;  %vm1827_vm3 = vweird.f32 %v1821_v11 }
 0x5b8   :  { %v4026_v47 = vadd.f32 1.0, %v2768_v37  ;;  %v1815_v3 = vor.u32 1.1754944e-38, %v1814_v20  ;;  %v1834_v10 = vor.u32 1.1754944e-38, %v1833_v9  ;;  %vm1813_vm5 = vcmp.eq.f32.partialorder %v1812_v13, 8.507059e+37 }
 0x5b9   :  { %2773 = vtanh.f32 %v1536_v41  ;;  %v1527_v59 = vsel %vm1526_vm14, %v2760_v19, %v1523_v48  ;;  %vm1832_vm7 = vcmp.eq.f32.partialorder %v1831_v44, 8.507059e+37 }
 0x5ba   :  { %2775 = vrcp.f32 %v4026_v47  ;;  %v1532_v21 = vsel %vm1529_vm15, %v1531_v60, %v1527_v59  ;;  %v1853_v27 = vand.u32 2147483648, %v4026_v47  ;;  %vm1847_vm9 = vweird.f32 %v4026_v47 }
 0x5bb   :  { %v2770_v43 = vpop.eup %2769  ;;  %2777 = vtanh.f32 %v1783_v28  ;;  %v1851_v54 = vand.u32 2147483647, %v4026_v47 }
 0x5bc   :  { %v2772_v6 = vpop.eup %2771  ;;  %v1804_v53 = vmul.f32 %v2770_v43, %v1802_v17  ;;  %vm1809_vm0 = vweird.f32 %v2770_v43  ;;  %v1854_v5 = vor.u32 1.1754944e-38, %v1853_v27 }
 0x5bd   :  { %v1823_v61 = vmul.f32 %v2772_v6, %v1821_v11  ;;  %vm1828_vm1 = vweird.f32 %v2772_v6  ;;  %vm1810_vm4 = vmor %vm1808_vm2, %vm1809_vm0  ;;  %vm1852_vm11 = vcmp.eq.f32.partialorder %v1851_v54, 8.507059e+37 }
 0x5be   :  { %v1805_v1 = vsub.f32 1.0, %v1804_v53  ;;  %vm1829_vm6 = vmor %vm1827_vm3, %vm1828_vm1 }
 0x5bf   :  { %v2774_v7 = vpop.eup %2773  ;;  %v1824_v8 = vsub.f32 1.0, %v1823_v61 }
 0x5c0   :  { %v2776_v22 = vpop.eup %2775  ;;  %v1806_v32 = vmul.f32 %v2770_v43, %v1805_v1  ;;  %v1538_v33 = vmul.f32 %v2774_v7, %v1532_v21 }
 0x5c1   :  { %v1825_v34 = vmul.f32 %v2772_v6, %v1824_v8  ;;  %v1843_v35 = vmul.f32 %v2776_v22, %v4026_v47  ;;  %v2778_v52 = vpop.eup %2777  ;;  %vm1848_vm8 = vweird.f32 %v2776_v22 }
 0x5c2   :  { %v1807_v51 = vadd.f32 %v2770_v43, %v1806_v32  ;;  %v1862_v50 = vpack.c.bf16 %v1538_v33, %v1538_v33  ;;  %vm1849_vm10 = vmor %vm1847_vm9, %vm1848_vm8 }
 0x5c3   :  { %v1844_v2 = vsub.f32 1.0, %v1843_v35  ;;  %v1826_v4 = vadd.f32 %v2772_v6, %v1825_v34 }
 0x5c4   :  { %v1811_v14 = vsel %vm1810_vm4, %v2770_v43, %v1807_v51  ;;  %2013 = vmatmul.bf16.vlgmr.msra.gmra.mxu1 %v1862_v50 }
 0x5c5   :  { %v1816_v15 = vsel %vm1813_vm5, %v1815_v3, %v1811_v14  ;;  %v1830_v29 = vsel %vm1829_vm6, %v2772_v6, %v1826_v4  ;;  %v1845_v26 = vmul.f32 %v2776_v22, %v1844_v2 }
 0x5c6   :  { %v1835_v36 = vsel %vm1832_vm7, %v1834_v10, %v1830_v29  ;;  %v1858_v45 = vmul.f32 %v2778_v52, %v1816_v15 }
 0x5c7   :  { %v1857_v46 = vmul.f32 0.0, %v1835_v36  ;;  %v1846_v19 = vadd.f32 %v2776_v22, %v1845_v26 }
 0x5c9   :  { %v1859_v12 = vadd.f32 %v1858_v45, %v1857_v46  ;;  %v1850_v57 = vsel %vm1849_vm10, %v2776_v22, %v1846_v19 }
 0x5ca   :  { %v1855_v55 = vsel %vm1852_vm11, %v1854_v5, %v1850_v57 }
 0x5cb   :  { %2779 = vtanh.f32 %v1859_v12 }
 0x5d1   :  { %v2780_v25 = vpop.eup %2779 }
 0x5d2   :  { %v1861_v23 = vmul.f32 %v2780_v25, %v1855_v55 }
 0x5d4   :  { %v1879_v58 = vpack.c.bf16 %v1861_v23, %v1861_v23 }
 0x5d6   :  { %1952 = vmatmul.bf16.vlgmr.msra.gmra.mxu0 %v1879_v58 }
 0x641   :  { %v2014_v31 = vpop.f32.mrf.mxu1 }
 0x649   :  { %v2016_v62 = vpop.f32.mrf.mxu1 }
 0x653   :  { %v1953_v42 = vpop.f32.mrf.mxu0 }
 0x654   :  { %v2015_v39 = vadd.f32 %v2014_v31, %v1953_v42 }
 0x656   :  { %v2022_v17 = vadd.f32 %v2636_v40, %v2015_v39 }
 0x658   :  { %2023 = vst [vmem:[%s4050_s8] sm:$0xff] %v2022_v17 }
 0x65b   :  { %v1955_v63 = vpop.f32.mrf.mxu0 }

</bundles_post_ra>
